<compile_context>
chip_gen: v7x
topology: tpu7x:2x2x1
jax: 0.10.0
libtpu: 0.0.40
codegen_flags: <defaults>
</compile_context>

<pallas_src>
import functools

import jax
import jax.numpy as jnp
from jax.experimental import pallas as pl
from jax.experimental.pallas import tpu as pltpu


def _silu(x):
    return x * jax.nn.sigmoid(x)


# ---------------------------------------------------------------------------
# Fused kernel: one grid step processes a block of `bblk` images end-to-end.
# ---------------------------------------------------------------------------
def _resnet_block_kernel(x_ref, cond_ref, wmlp_ref, bmlp_ref, mask_ref,
                         w1_ref, b1_ref, g1_ref, be1_ref, agg_ref,
                         w2_ref, b2_ref, g2_ref, be2_ref, wr_ref, br_ref,
                         o_ref, tap1_ref, tap2_ref, *, W, c_in, c_out, bblk):
    f32 = jnp.float32
    N = o_ref.shape[-1]

    # Batch-invariant loads, hoisted out of the per-image loop (VMEM resident).
    wmlp = wmlp_ref[...]
    bmlp = bmlp_ref[...]
    agg = agg_ref[...]
    w1, b1, g1, be1 = w1_ref[...], b1_ref[...], g1_ref[...], be1_ref[...]
    w2, b2, g2, be2 = w2_ref[...], b2_ref[...], g2_ref[...], be2_ref[...]
    wr, br = wr_ref[...], br_ref[...]
    masks = [mask_ref[k] for k in range(9)]                     # 9 x (1, N)

    def conv3x3(inp, tap_ref, w_flat, bias, cin):
        # Stack the 9 shifted+masked taps into one (9*cin, N) VMEM tile, then do a
        # single (c_out, 9*cin) @ (9*cin, N) MXU dot (accumulation on the MXU).
        for k in range(9):
            dy, dx = k // 3 - 1, k % 3 - 1
            shift = (-(dy * W + dx)) % N                        # static, non-negative
            xs = inp if shift == 0 else pltpu.roll(inp, shift, 1)
            tap_ref[k * cin:(k + 1) * cin, :] = xs * masks[k]   # zero padding
        return jnp.dot(w_flat, tap_ref[...], preferred_element_type=f32) + bias

    def group_norm(h, gamma, beta):
        # Lane reduction first (exact f32), then tiny group-averaging dots.
        m = jnp.mean(h, axis=1, keepdims=True)                  # (c_out, 1)
        gm = jnp.dot(agg, m, preferred_element_type=f32)        # group mean
        d = h - gm
        v = jnp.mean(d * d, axis=1, keepdims=True)
        gv = jnp.dot(agg, v, preferred_element_type=f32)        # group variance
        return d * (jax.lax.rsqrt(gv + 1e-5) * gamma) + beta

    def per_image(i):
        # ---- conditioning MLP: SiLU -> Linear (row-broadcast + lane reduce) ----
        c = _silu(cond_ref[i])                                  # (1, Dc), f32
        emb = jnp.sum(wmlp * c, axis=1, keepdims=True) + bmlp   # (2*c_out, 1)
        scale1 = emb[0:c_out, :] + 1.0                          # scale + 1
        shift = emb[c_out:2 * c_out, :]

        x = x_ref[i].astype(f32)                                # (c_in, N) bf16 -> f32

        # ---- block1: WSConv3x3 -> GroupNorm with fused FiLM scale/shift -> SiLU ----
        h = conv3x3(x, tap1_ref, w1, b1, c_in)
        h = _silu(group_norm(h, g1 * scale1, be1 * scale1 + shift))

        # ---- block2: WSConv3x3 -> GroupNorm -> SiLU ----
        h = conv3x3(h, tap2_ref, w2, b2, c_out)
        h = _silu(group_norm(h, g2, be2))

        # ---- residual 1x1 conv + add (lane-dense (c_out, N) store) ----
        res = jnp.dot(wr, x, preferred_element_type=f32) + br
        o_ref[i] = (h + res).astype(o_ref.dtype)

    if bblk == 1:
        per_image(0)
    else:
        pl.loop(0, bblk)(per_image)


# ---------------------------------------------------------------------------
# Wrapper: parameter re-layout + weight standardization (one-time glue) + pallas_call.
# ---------------------------------------------------------------------------
def resnet_block_forward(x, time_emb, class_emb, params, *, groups,
                         mask_emb=None, bblk=None):
    if mask_emb is not None:                      # channel concat is pure input glue
        x = jnp.concatenate([x, mask_emb], axis=1)

    B, c_in, H, W = x.shape
    N = H * W
    c_out = params["w1"].shape[0]
    cg = c_out // groups
    f32 = jnp.float32

    # Batch blocking: largest divisor of B keeping >= 2 grid steps (v7x dual-TC).
    if bblk is None:
        bblk = 1
        if B > 2:
            for d in range(B // 2, 0, -1):
                if B % d == 0:
                    bblk = d
                    break
    assert B % bblk == 0
    nblk = B // bblk

    # free reshape: NCHW -> (B, C, N), bf16 activation I/O (elementwise stays f32 in-kernel)
    x_seq = x.reshape(B, c_in, N).astype(jnp.bfloat16)

    # TODO(synk): path without time/class conditioning (scale_shift=None) and the
    # Identity residual (dim_in == dim_out) are not wired here.
    cond = jnp.concatenate([time_emb, class_emb], axis=-1).astype(f32)   # (B, Dc)
    Dc = cond.shape[-1]
    cond_row = cond.reshape(B, 1, Dc)

    # Weight standardization hoisted out of the kernel (batch-invariant).
    def std_weight(w):                              # (O, I, 3, 3), unbiased=False
        mu = jnp.mean(w, axis=(1, 2, 3), keepdims=True)
        var = jnp.mean((w - mu) ** 2, axis=(1, 2, 3), keepdims=True)
        return (w - mu) * jax.lax.rsqrt(var + 1e-5)

    def flat_taps(w):                               # (O, I, 3, 3) -> (O, 9*I), col = tap*I + i
        o, i = w.shape[0], w.shape[1]
        return jnp.transpose(w, (0, 2, 3, 1)).reshape(o, 9 * i)

    col = lambda v: v.reshape(-1, 1).astype(f32)
    w1 = flat_taps(std_weight(params["w1"].astype(f32)))
    w2 = flat_taps(std_weight(params["w2"].astype(f32)))
    b1, g1, be1 = col(params["b1"]), col(params["gn1_w"]), col(params["gn1_b"])
    b2, g2, be2 = col(params["b2"]), col(params["gn2_w"]), col(params["gn2_b"])
    wmlp = params["w_mlp"].astype(f32)              # (2*c_out, Dc)
    bmlp = col(params["b_mlp"])
    wr = params["wr"].reshape(c_out, c_in).astype(f32)
    br = col(params["br"])

    # 3x3-tap validity masks on the flattened H*W axis (implements zero padding).
    rows = jnp.arange(N, dtype=jnp.int32) // W
    cols = jnp.arange(N, dtype=jnp.int32) % W
    masks = []
    for dy in (-1, 0, 1):
        for dx in (-1, 0, 1):
            ok = ((rows + dy >= 0) & (rows + dy < H) &
                  (cols + dx >= 0) & (cols + dx < W))
            masks.append(ok.astype(f32))
    masks = jnp.stack(masks).reshape(9, 1, N)

    # GroupNorm group-averaging matrix (contiguous channel groups).
    gidx = jnp.arange(c_out) // cg
    agg = (gidx[:, None] == gidx[None, :]).astype(f32) / cg

    kernel = functools.partial(_resnet_block_kernel,
                               W=W, c_in=c_in, c_out=c_out, bblk=bblk)
    bcast2 = lambda b: (0, 0)

    out = pl.pallas_call(
        kernel,
        out_shape=jax.ShapeDtypeStruct((B, c_out, N), f32),
        grid=(nblk,),
        in_specs=[
            pl.BlockSpec((bblk, c_in, N), lambda b: (b, 0, 0)),     # x (bf16)
            pl.BlockSpec((bblk, 1, Dc), lambda b: (b, 0, 0)),       # cond
            pl.BlockSpec((2 * c_out, Dc), bcast2),                  # w_mlp
            pl.BlockSpec((2 * c_out, 1), bcast2),                   # b_mlp
            pl.BlockSpec((9, 1, N), lambda b: (0, 0, 0)),           # tap masks
            pl.BlockSpec((c_out, 9 * c_in), bcast2),                # std w1 (flat taps)
            pl.BlockSpec((c_out, 1), bcast2),                       # b1
            pl.BlockSpec((c_out, 1), bcast2),                       # gn1 gamma
            pl.BlockSpec((c_out, 1), bcast2),                       # gn1 beta
            pl.BlockSpec((c_out, c_out), bcast2),                   # group-avg matrix
            pl.BlockSpec((c_out, 9 * c_out), bcast2),               # std w2 (flat taps)
            pl.BlockSpec((c_out, 1), bcast2),                       # b2
            pl.BlockSpec((c_out, 1), bcast2),                       # gn2 gamma
            pl.BlockSpec((c_out, 1), bcast2),                       # gn2 beta
            pl.BlockSpec((c_out, c_in), bcast2),                    # res conv weight
            pl.BlockSpec((c_out, 1), bcast2),                       # res conv bias
        ],
        out_specs=pl.BlockSpec((bblk, c_out, N), lambda b: (b, 0, 0)),
        scratch_shapes=[pltpu.VMEM((9 * c_in, N), f32),             # conv1 tap stack
                        pltpu.VMEM((9 * c_out, N), f32)],           # conv2 tap stack
        compiler_params=pltpu.CompilerParams(dimension_semantics=("parallel",)),
    )(x_seq, cond_row, wmlp, bmlp, masks,
      w1, b1, g1, be1, agg, w2, b2, g2, be2, wr, br)

    return out.reshape(B, c_out, H, W)


# ---------------------------------------------------------------------------
# Plain-JAX reference (mirrors the PyTorch forward exactly)
# ---------------------------------------------------------------------------
def _ws_conv3x3_ref(x, w, b):
    mean = jnp.mean(w, axis=(1, 2, 3), keepdims=True)
    var = jnp.mean((w - mean) ** 2, axis=(1, 2, 3), keepdims=True)
    wn = (w - mean) * jax.lax.rsqrt(var + 1e-5)
    dn = ("NCHW", "OIHW", "NCHW")
    y = jax.lax.conv_general_dilated(x, wn, (1, 1), ((1, 1), (1, 1)),
                                     dimension_numbers=dn)
    return y + b.reshape(1, -1, 1, 1)


def _group_norm_ref(x, gamma, beta, groups, eps=1e-5):
    B, C, H, W = x.shape
    xg = x.reshape(B, groups, C // groups, H * W)
    m = jnp.mean(xg, axis=(2, 3), keepdims=True)
    v = jnp.mean((xg - m) ** 2, axis=(2, 3), keepdims=True)
    xn = ((xg - m) * jax.lax.rsqrt(v + eps)).reshape(B, C, H, W)
    return xn * gamma.reshape(1, C, 1, 1) + beta.reshape(1, C, 1, 1)


def resnet_block_ref(x, time_emb, class_emb, params, *, groups):
    cond = jnp.concatenate([time_emb, class_emb], axis=-1)
    emb = jax.nn.silu(cond) @ params["w_mlp"].T + params["b_mlp"]
    scale, shift = jnp.split(emb, 2, axis=-1)
    h = _ws_conv3x3_ref(x, params["w1"], params["b1"])
    h = _group_norm_ref(h, params["gn1_w"], params["gn1_b"], groups)
    h = h * (scale[:, :, None, None] + 1.0) + shift[:, :, None, None]
    h = jax.nn.silu(h)
    h = _ws_conv3x3_ref(h, params["w2"], params["b2"])
    h = _group_norm_ref(h, params["gn2_w"], params["gn2_b"], groups)
    h = jax.nn.silu(h)
    dn = ("NCHW", "OIHW", "NCHW")
    res = jax.lax.conv_general_dilated(x, params["wr"], (1, 1), "VALID",
                                       dimension_numbers=dn)
    return h + res + params["br"].reshape(1, -1, 1, 1)


# ---------------------------------------------------------------------------
if __name__ == "__main__":
    B, C_in, H, W = 2, 4, 16, 16
    C_out, groups = 8, 4
    time_dim, class_dim = 16, 8

    ks = jax.random.split(jax.random.PRNGKey(0), 16)

    x = jax.random.normal(ks[0], (B, C_in, H, W), jnp.float32)
    time_emb = jax.random.normal(ks[1], (B, time_dim), jnp.float32)
    class_emb = jax.random.normal(ks[2], (B, class_dim), jnp.float32)

    params = dict(
        w1=jax.random.normal(ks[3], (C_out, C_in, 3, 3), jnp.float32) * 0.2,
        b1=jax.random.normal(ks[4], (C_out,), jnp.float32) * 0.1,
        gn1_w=1.0 + 0.1 * jax.random.normal(ks[5], (C_out,), jnp.float32),
        gn1_b=0.1 * jax.random.normal(ks[6], (C_out,), jnp.float32),
        w2=jax.random.normal(ks[7], (C_out, C_out, 3, 3), jnp.float32) * 0.2,
        b2=jax.random.normal(ks[8], (C_out,), jnp.float32) * 0.1,
        gn2_w=1.0 + 0.1 * jax.random.normal(ks[9], (C_out,), jnp.float32),
        gn2_b=0.1 * jax.random.normal(ks[10], (C_out,), jnp.float32),
        w_mlp=jax.random.normal(ks[11], (2 * C_out, time_dim + class_dim), jnp.float32) * 0.1,
        b_mlp=jax.random.normal(ks[12], (2 * C_out,), jnp.float32) * 0.1,
        wr=jax.random.normal(ks[13], (C_out, C_in, 1, 1), jnp.float32) * 0.3,
        br=jax.random.normal(ks[14], (C_out,), jnp.float32) * 0.1,
    )

    y = resnet_block_forward(x, time_emb, class_emb, params, groups=groups)
    y = jax.block_until_ready(y)

    y_ref = resnet_block_ref(x, time_emb, class_emb, params, groups=groups)

    assert y.shape == (B, C_out, H, W)
    err = float(jnp.max(jnp.abs(y - y_ref)))
    assert jnp.allclose(y, y_ref, atol=5e-2, rtol=5e-2), \
        f"mismatch vs reference, max|diff|={err:.3e}"

    print("KERNEL_OK")
</pallas_src>

<mosaic_0001>
module attributes {stable_mosaic.version = 11 : i64} {
  func.func @_resnet_block_kernel(%arg0: i32, %arg1: memref<1x4x256xbf16, #tpu.memory_space<vmem>>, %arg2: memref<1x1x24xf32, #tpu.memory_space<vmem>>, %arg3: memref<16x24xf32, #tpu.memory_space<vmem>>, %arg4: memref<16x1xf32, #tpu.memory_space<vmem>>, %arg5: memref<9x1x256xf32, #tpu.memory_space<vmem>>, %arg6: memref<8x36xf32, #tpu.memory_space<vmem>>, %arg7: memref<8x1xf32, #tpu.memory_space<vmem>>, %arg8: memref<8x1xf32, #tpu.memory_space<vmem>>, %arg9: memref<8x1xf32, #tpu.memory_space<vmem>>, %arg10: memref<8x8xf32, #tpu.memory_space<vmem>>, %arg11: memref<8x72xf32, #tpu.memory_space<vmem>>, %arg12: memref<8x1xf32, #tpu.memory_space<vmem>>, %arg13: memref<8x1xf32, #tpu.memory_space<vmem>>, %arg14: memref<8x1xf32, #tpu.memory_space<vmem>>, %arg15: memref<8x4xf32, #tpu.memory_space<vmem>>, %arg16: memref<8x1xf32, #tpu.memory_space<vmem>>, %arg17: memref<1x8x256xf32, #tpu.memory_space<vmem>>, %arg18: memref<36x256xf32, #tpu.memory_space<vmem>>, %arg19: memref<72x256xf32, #tpu.memory_space<vmem>>) attributes {dimension_semantics = [#tpu.dimension_semantics<parallel>], iteration_bounds = array<i64: 2>, scalar_prefetch = 0 : i64, scratch_operands = 2 : i64, tpu.core_type = #tpu.core_type<tc>, window_params = [{transform_indices = @transform_0, window_bounds = array<i64: 1, 4, 256>}, {transform_indices = @transform_1, window_bounds = array<i64: 1, 1, 24>}, {pipeline_mode = #tpu.pipeline_mode<synchronous>, transform_indices = @transform_2, window_bounds = array<i64: 16, 24>}, {pipeline_mode = #tpu.pipeline_mode<synchronous>, transform_indices = @transform_3, window_bounds = array<i64: 16, 1>}, {pipeline_mode = #tpu.pipeline_mode<synchronous>, transform_indices = @transform_4, window_bounds = array<i64: 9, 1, 256>}, {pipeline_mode = #tpu.pipeline_mode<synchronous>, transform_indices = @transform_5, window_bounds = array<i64: 8, 36>}, {pipeline_mode = #tpu.pipeline_mode<synchronous>, transform_indices = @transform_6, window_bounds = array<i64: 8, 1>}, {pipeline_mode = #tpu.pipeline_mode<synchronous>, transform_indices = @transform_7, window_bounds = array<i64: 8, 1>}, {pipeline_mode = #tpu.pipeline_mode<synchronous>, transform_indices = @transform_8, window_bounds = array<i64: 8, 1>}, {pipeline_mode = #tpu.pipeline_mode<synchronous>, transform_indices = @transform_9, window_bounds = array<i64: 8, 8>}, {pipeline_mode = #tpu.pipeline_mode<synchronous>, transform_indices = @transform_10, window_bounds = array<i64: 8, 72>}, {pipeline_mode = #tpu.pipeline_mode<synchronous>, transform_indices = @transform_11, window_bounds = array<i64: 8, 1>}, {pipeline_mode = #tpu.pipeline_mode<synchronous>, transform_indices = @transform_12, window_bounds = array<i64: 8, 1>}, {pipeline_mode = #tpu.pipeline_mode<synchronous>, transform_indices = @transform_13, window_bounds = array<i64: 8, 1>}, {pipeline_mode = #tpu.pipeline_mode<synchronous>, transform_indices = @transform_14, window_bounds = array<i64: 8, 4>}, {pipeline_mode = #tpu.pipeline_mode<synchronous>, transform_indices = @transform_15, window_bounds = array<i64: 8, 1>}, {transform_indices = @transform_16, window_bounds = array<i64: 1, 8, 256>}]} {
    %c0 = arith.constant 0 : index
    %c0_0 = arith.constant 0 : index
    %0 = vector.load %arg3[%c0, %c0_0] : memref<16x24xf32, #tpu.memory_space<vmem>>, vector<16x24xf32>
    %c0_1 = arith.constant 0 : index
    %c0_2 = arith.constant 0 : index
    %1 = vector.load %arg4[%c0_1, %c0_2] : memref<16x1xf32, #tpu.memory_space<vmem>>, vector<16x1xf32>
    %c0_3 = arith.constant 0 : index
    %c0_4 = arith.constant 0 : index
    %2 = vector.load %arg10[%c0_3, %c0_4] : memref<8x8xf32, #tpu.memory_space<vmem>>, vector<8x8xf32>
    %c0_5 = arith.constant 0 : index
    %c0_6 = arith.constant 0 : index
    %3 = vector.load %arg6[%c0_5, %c0_6] : memref<8x36xf32, #tpu.memory_space<vmem>>, vector<8x36xf32>
    %c0_7 = arith.constant 0 : index
    %c0_8 = arith.constant 0 : index
    %4 = vector.load %arg7[%c0_7, %c0_8] : memref<8x1xf32, #tpu.memory_space<vmem>>, vector<8x1xf32>
    %c0_9 = arith.constant 0 : index
    %c0_10 = arith.constant 0 : index
    %5 = vector.load %arg8[%c0_9, %c0_10] : memref<8x1xf32, #tpu.memory_space<vmem>>, vector<8x1xf32>
    %c0_11 = arith.constant 0 : index
    %c0_12 = arith.constant 0 : index
    %6 = vector.load %arg9[%c0_11, %c0_12] : memref<8x1xf32, #tpu.memory_space<vmem>>, vector<8x1xf32>
    %c0_13 = arith.constant 0 : index
    %c0_14 = arith.constant 0 : index
    %7 = vector.load %arg11[%c0_13, %c0_14] : memref<8x72xf32, #tpu.memory_space<vmem>>, vector<8x72xf32>
    %c0_15 = arith.constant 0 : index
    %c0_16 = arith.constant 0 : index
    %8 = vector.load %arg12[%c0_15, %c0_16] : memref<8x1xf32, #tpu.memory_space<vmem>>, vector<8x1xf32>
    %c0_17 = arith.constant 0 : index
    %c0_18 = arith.constant 0 : index
    %9 = vector.load %arg13[%c0_17, %c0_18] : memref<8x1xf32, #tpu.memory_space<vmem>>, vector<8x1xf32>
    %c0_19 = arith.constant 0 : index
    %c0_20 = arith.constant 0 : index
    %10 = vector.load %arg14[%c0_19, %c0_20] : memref<8x1xf32, #tpu.memory_space<vmem>>, vector<8x1xf32>
    %c0_21 = arith.constant 0 : index
    %c0_22 = arith.constant 0 : index
    %11 = vector.load %arg15[%c0_21, %c0_22] : memref<8x4xf32, #tpu.memory_space<vmem>>, vector<8x4xf32>
    %c0_23 = arith.constant 0 : index
    %c0_24 = arith.constant 0 : index
    %12 = vector.load %arg16[%c0_23, %c0_24] : memref<8x1xf32, #tpu.memory_space<vmem>>, vector<8x1xf32>
    %c0_25 = arith.constant 0 : index
    %c0_26 = arith.constant 0 : index
    %c0_27 = arith.constant 0 : index
    %13 = vector.load %arg5[%c0_25, %c0_26, %c0_27] : memref<9x1x256xf32, #tpu.memory_space<vmem>>, vector<1x1x256xf32>
    %14 = vector.shape_cast %13 : vector<1x1x256xf32> to vector<1x256xf32>
    %c1 = arith.constant 1 : index
    %c0_28 = arith.constant 0 : index
    %c0_29 = arith.constant 0 : index
    %15 = vector.load %arg5[%c1, %c0_28, %c0_29] : memref<9x1x256xf32, #tpu.memory_space<vmem>>, vector<1x1x256xf32>
    %16 = vector.shape_cast %15 : vector<1x1x256xf32> to vector<1x256xf32>
    %c2 = arith.constant 2 : index
    %c0_30 = arith.constant 0 : index
    %c0_31 = arith.constant 0 : index
    %17 = vector.load %arg5[%c2, %c0_30, %c0_31] : memref<9x1x256xf32, #tpu.memory_space<vmem>>, vector<1x1x256xf32>
    %18 = vector.shape_cast %17 : vector<1x1x256xf32> to vector<1x256xf32>
    %c3 = arith.constant 3 : index
    %c0_32 = arith.constant 0 : index
    %c0_33 = arith.constant 0 : index
    %19 = vector.load %arg5[%c3, %c0_32, %c0_33] : memref<9x1x256xf32, #tpu.memory_space<vmem>>, vector<1x1x256xf32>
    %20 = vector.shape_cast %19 : vector<1x1x256xf32> to vector<1x256xf32>
    %c4 = arith.constant 4 : index
    %c0_34 = arith.constant 0 : index
    %c0_35 = arith.constant 0 : index
    %21 = vector.load %arg5[%c4, %c0_34, %c0_35] : memref<9x1x256xf32, #tpu.memory_space<vmem>>, vector<1x1x256xf32>
    %22 = vector.shape_cast %21 : vector<1x1x256xf32> to vector<1x256xf32>
    %c5 = arith.constant 5 : index
    %c0_36 = arith.constant 0 : index
    %c0_37 = arith.constant 0 : index
    %23 = vector.load %arg5[%c5, %c0_36, %c0_37] : memref<9x1x256xf32, #tpu.memory_space<vmem>>, vector<1x1x256xf32>
    %24 = vector.shape_cast %23 : vector<1x1x256xf32> to vector<1x256xf32>
    %c6 = arith.constant 6 : index
    %c0_38 = arith.constant 0 : index
    %c0_39 = arith.constant 0 : index
    %25 = vector.load %arg5[%c6, %c0_38, %c0_39] : memref<9x1x256xf32, #tpu.memory_space<vmem>>, vector<1x1x256xf32>
    %26 = vector.shape_cast %25 : vector<1x1x256xf32> to vector<1x256xf32>
    %c7 = arith.constant 7 : index
    %c0_40 = arith.constant 0 : index
    %c0_41 = arith.constant 0 : index
    %27 = vector.load %arg5[%c7, %c0_40, %c0_41] : memref<9x1x256xf32, #tpu.memory_space<vmem>>, vector<1x1x256xf32>
    %28 = vector.shape_cast %27 : vector<1x1x256xf32> to vector<1x256xf32>
    %c8 = arith.constant 8 : index
    %c0_42 = arith.constant 0 : index
    %c0_43 = arith.constant 0 : index
    %29 = vector.load %arg5[%c8, %c0_42, %c0_43] : memref<9x1x256xf32, #tpu.memory_space<vmem>>, vector<1x1x256xf32>
    %30 = vector.shape_cast %29 : vector<1x1x256xf32> to vector<1x256xf32>
    %c0_44 = arith.constant 0 : index
    %c0_45 = arith.constant 0 : index
    %c0_46 = arith.constant 0 : index
    %31 = vector.load %arg2[%c0_44, %c0_45, %c0_46] : memref<1x1x24xf32, #tpu.memory_space<vmem>>, vector<1x1x24xf32>
    %32 = vector.shape_cast %31 : vector<1x1x24xf32> to vector<1x24xf32>
    %33 = arith.negf %32 : vector<1x24xf32>
    %34 = math.exp %33 : vector<1x24xf32>
    %cst = arith.constant 1.000000e+00 : f32
    %35 = vector.broadcast %cst : f32 to vector<1x24xf32>
    %36 = arith.addf %35, %34 : vector<1x24xf32>
    %37 = arith.divf %35, %36 : vector<1x24xf32>
    %38 = arith.mulf %32, %37 : vector<1x24xf32>
    %39 = vector.broadcast %38 : vector<1x24xf32> to vector<16x24xf32>
    %40 = arith.mulf %0, %39 : vector<16x24xf32>
    %cst_47 = arith.constant dense<0.000000e+00> : vector<16xf32>
    %41 = vector.multi_reduction <add>, %40, %cst_47 [1] : vector<16x24xf32> to vector<16xf32>
    %42 = vector.shape_cast %41 : vector<16xf32> to vector<16x1xf32>
    %43 = arith.addf %42, %1 : vector<16x1xf32>
    %44 = vector.extract_strided_slice %43 {offsets = [0, 0], sizes = [8, 1], strides = [1, 1]} : vector<16x1xf32> to vector<8x1xf32>
    %cst_48 = arith.constant 1.000000e+00 : f32
    %45 = vector.broadcast %cst_48 : f32 to vector<8x1xf32>
    %46 = arith.addf %44, %45 : vector<8x1xf32>
    %47 = vector.extract_strided_slice %43 {offsets = [8, 0], sizes = [8, 1], strides = [1, 1]} : vector<16x1xf32> to vector<8x1xf32>
    %c0_49 = arith.constant 0 : index
    %c0_50 = arith.constant 0 : index
    %c0_51 = arith.constant 0 : index
    %48 = vector.load %arg1[%c0_49, %c0_50, %c0_51] : memref<1x4x256xbf16, #tpu.memory_space<vmem>>, vector<1x4x256xbf16>
    %49 = vector.shape_cast %48 : vector<1x4x256xbf16> to vector<4x256xbf16>
    %50 = arith.extf %49 : vector<4x256xbf16> to vector<4x256xf32>
    %c17_i32 = arith.constant 17 : i32
    %51 = tpu.dynamic_rotate %50 by %c17_i32 dim 1 : vector<4x256xf32>, i32 -> vector<4x256xf32>
    %52 = vector.broadcast %14 : vector<1x256xf32> to vector<4x256xf32>
    %53 = arith.mulf %51, %52 : vector<4x256xf32>
    %c0_52 = arith.constant 0 : index
    %c0_53 = arith.constant 0 : index
    %54 = vector.load %arg18[%c0_52, %c0_53] : memref<36x256xf32, #tpu.memory_space<vmem>>, vector<4x256xf32>
    tpu.vector_store %arg18[%c0_52, %c0_53], %53 {strides = array<i32>} : memref<36x256xf32, #tpu.memory_space<vmem>>, vector<4x256xf32>,
    %c16_i32 = arith.constant 16 : i32
    %55 = tpu.dynamic_rotate %50 by %c16_i32 dim 1 : vector<4x256xf32>, i32 -> vector<4x256xf32>
    %56 = vector.broadcast %16 : vector<1x256xf32> to vector<4x256xf32>
    %57 = arith.mulf %55, %56 : vector<4x256xf32>
    %c4_54 = arith.constant 4 : index
    %c0_55 = arith.constant 0 : index
    %58 = vector.load %arg18[%c4_54, %c0_55] : memref<36x256xf32, #tpu.memory_space<vmem>>, vector<4x256xf32>
    tpu.vector_store %arg18[%c4_54, %c0_55], %57 {strides = array<i32>} : memref<36x256xf32, #tpu.memory_space<vmem>>, vector<4x256xf32>,
    %c15_i32 = arith.constant 15 : i32
    %59 = tpu.dynamic_rotate %50 by %c15_i32 dim 1 : vector<4x256xf32>, i32 -> vector<4x256xf32>
    %60 = vector.broadcast %18 : vector<1x256xf32> to vector<4x256xf32>
    %61 = arith.mulf %59, %60 : vector<4x256xf32>
    %c8_56 = arith.constant 8 : index
    %c0_57 = arith.constant 0 : index
    %62 = vector.load %arg18[%c8_56, %c0_57] : memref<36x256xf32, #tpu.memory_space<vmem>>, vector<4x256xf32>
    tpu.vector_store %arg18[%c8_56, %c0_57], %61 {strides = array<i32>} : memref<36x256xf32, #tpu.memory_space<vmem>>, vector<4x256xf32>,
    %c1_i32 = arith.constant 1 : i32
    %63 = tpu.dynamic_rotate %50 by %c1_i32 dim 1 : vector<4x256xf32>, i32 -> vector<4x256xf32>
    %64 = vector.broadcast %20 : vector<1x256xf32> to vector<4x256xf32>
    %65 = arith.mulf %63, %64 : vector<4x256xf32>
    %c12 = arith.constant 12 : index
    %c0_58 = arith.constant 0 : index
    %66 = vector.load %arg18[%c12, %c0_58] : memref<36x256xf32, #tpu.memory_space<vmem>>, vector<4x256xf32>
    tpu.vector_store %arg18[%c12, %c0_58], %65 {strides = array<i32>} : memref<36x256xf32, #tpu.memory_space<vmem>>, vector<4x256xf32>,
    %67 = vector.broadcast %22 : vector<1x256xf32> to vector<4x256xf32>
    %68 = arith.mulf %50, %67 : vector<4x256xf32>
    %c16 = arith.constant 16 : index
    %c0_59 = arith.constant 0 : index
    %69 = vector.load %arg18[%c16, %c0_59] : memref<36x256xf32, #tpu.memory_space<vmem>>, vector<4x256xf32>
    tpu.vector_store %arg18[%c16, %c0_59], %68 {strides = array<i32>} : memref<36x256xf32, #tpu.memory_space<vmem>>, vector<4x256xf32>,
    %c255_i32 = arith.constant 255 : i32
    %70 = tpu.dynamic_rotate %50 by %c255_i32 dim 1 : vector<4x256xf32>, i32 -> vector<4x256xf32>
    %71 = vector.broadcast %24 : vector<1x256xf32> to vector<4x256xf32>
    %72 = arith.mulf %70, %71 : vector<4x256xf32>
    %c20 = arith.constant 20 : index
    %c0_60 = arith.constant 0 : index
    %73 = vector.load %arg18[%c20, %c0_60] : memref<36x256xf32, #tpu.memory_space<vmem>>, vector<4x256xf32>
    tpu.vector_store %arg18[%c20, %c0_60], %72 {strides = array<i32>} : memref<36x256xf32, #tpu.memory_space<vmem>>, vector<4x256xf32>,
    %c241_i32 = arith.constant 241 : i32
    %74 = tpu.dynamic_rotate %50 by %c241_i32 dim 1 : vector<4x256xf32>, i32 -> vector<4x256xf32>
    %75 = vector.broadcast %26 : vector<1x256xf32> to vector<4x256xf32>
    %76 = arith.mulf %74, %75 : vector<4x256xf32>
    %c24 = arith.constant 24 : index
    %c0_61 = arith.constant 0 : index
    %77 = vector.load %arg18[%c24, %c0_61] : memref<36x256xf32, #tpu.memory_space<vmem>>, vector<4x256xf32>
    tpu.vector_store %arg18[%c24, %c0_61], %76 {strides = array<i32>} : memref<36x256xf32, #tpu.memory_space<vmem>>, vector<4x256xf32>,
    %c240_i32 = arith.constant 240 : i32
    %78 = tpu.dynamic_rotate %50 by %c240_i32 dim 1 : vector<4x256xf32>, i32 -> vector<4x256xf32>
    %79 = vector.broadcast %28 : vector<1x256xf32> to vector<4x256xf32>
    %80 = arith.mulf %78, %79 : vector<4x256xf32>
    %c28 = arith.constant 28 : index
    %c0_62 = arith.constant 0 : index
    %81 = vector.load %arg18[%c28, %c0_62] : memref<36x256xf32, #tpu.memory_space<vmem>>, vector<4x256xf32>
    tpu.vector_store %arg18[%c28, %c0_62], %80 {strides = array<i32>} : memref<36x256xf32, #tpu.memory_space<vmem>>, vector<4x256xf32>,
    %c239_i32 = arith.constant 239 : i32
    %82 = tpu.dynamic_rotate %50 by %c239_i32 dim 1 : vector<4x256xf32>, i32 -> vector<4x256xf32>
    %83 = vector.broadcast %30 : vector<1x256xf32> to vector<4x256xf32>
    %84 = arith.mulf %82, %83 : vector<4x256xf32>
    %c32 = arith.constant 32 : index
    %c0_63 = arith.constant 0 : index
    %85 = vector.load %arg18[%c32, %c0_63] : memref<36x256xf32, #tpu.memory_space<vmem>>, vector<4x256xf32>
    tpu.vector_store %arg18[%c32, %c0_63], %84 {strides = array<i32>} : memref<36x256xf32, #tpu.memory_space<vmem>>, vector<4x256xf32>,
    %c0_64 = arith.constant 0 : index
    %c0_65 = arith.constant 0 : index
    %86 = vector.load %arg18[%c0_64, %c0_65] : memref<36x256xf32, #tpu.memory_space<vmem>>, vector<36x256xf32>
    %cst_66 = arith.constant dense<0.000000e+00> : vector<8x256xf32>
    %87 = tpu.matmul %3, %86, %cst_66 {dimension_numbers = #tpu.dot_dimension_numbers<[1], [0], [0], [1], [0, 0, 1, 1], [], []>} : vector<8x36xf32>, vector<36x256xf32>, vector<8x256xf32> -> vector<8x256xf32>
    %88 = vector.broadcast %4 : vector<8x1xf32> to vector<8x256xf32>
    %89 = arith.addf %87, %88 : vector<8x256xf32>
    %90 = arith.mulf %5, %46 : vector<8x1xf32>
    %91 = arith.mulf %6, %46 : vector<8x1xf32>
    %92 = arith.addf %91, %47 : vector<8x1xf32>
    %cst_67 = arith.constant dense<0.000000e+00> : vector<8xf32>
    %93 = vector.multi_reduction <add>, %89, %cst_67 [1] : vector<8x256xf32> to vector<8xf32>
    %94 = vector.shape_cast %93 : vector<8xf32> to vector<8x1xf32>
    %cst_68 = arith.constant 2.560000e+02 : f32
    %95 = vector.broadcast %cst_68 : f32 to vector<8x1xf32>
    %96 = arith.divf %94, %95 : vector<8x1xf32>
    %cst_69 = arith.constant dense<0.000000e+00> : vector<8x1xf32>
    %97 = tpu.matmul %2, %96, %cst_69 {dimension_numbers = #tpu.dot_dimension_numbers<[1], [0], [0], [1], [0, 0, 1, 1], [], []>} : vector<8x8xf32>, vector<8x1xf32>, vector<8x1xf32> -> vector<8x1xf32>
    %98 = vector.broadcast %97 : vector<8x1xf32> to vector<8x256xf32>
    %99 = arith.subf %89, %98 : vector<8x256xf32>
    %100 = arith.mulf %99, %99 : vector<8x256xf32>
    %cst_70 = arith.constant dense<0.000000e+00> : vector<8xf32>
    %101 = vector.multi_reduction <add>, %100, %cst_70 [1] : vector<8x256xf32> to vector<8xf32>
    %102 = vector.shape_cast %101 : vector<8xf32> to vector<8x1xf32>
    %cst_71 = arith.constant 2.560000e+02 : f32
    %103 = vector.broadcast %cst_71 : f32 to vector<8x1xf32>
    %104 = arith.divf %102, %103 : vector<8x1xf32>
    %cst_72 = arith.constant dense<0.000000e+00> : vector<8x1xf32>
    %105 = tpu.matmul %2, %104, %cst_72 {dimension_numbers = #tpu.dot_dimension_numbers<[1], [0], [0], [1], [0, 0, 1, 1], [], []>} : vector<8x8xf32>, vector<8x1xf32>, vector<8x1xf32> -> vector<8x1xf32>
    %cst_73 = arith.constant 9.99999974E-6 : f32
    %106 = vector.broadcast %cst_73 : f32 to vector<8x1xf32>
    %107 = arith.addf %105, %106 : vector<8x1xf32>
    %108 = math.rsqrt %107 : vector<8x1xf32>
    %109 = arith.mulf %108, %90 : vector<8x1xf32>
    %110 = vector.broadcast %109 : vector<8x1xf32> to vector<8x256xf32>
    %111 = arith.mulf %99, %110 : vector<8x256xf32>
    %112 = vector.broadcast %92 : vector<8x1xf32> to vector<8x256xf32>
    %113 = arith.addf %111, %112 : vector<8x256xf32>
    %114 = arith.negf %113 : vector<8x256xf32>
    %115 = math.exp %114 : vector<8x256xf32>
    %cst_74 = arith.constant 1.000000e+00 : f32
    %116 = vector.broadcast %cst_74 : f32 to vector<8x256xf32>
    %117 = arith.addf %116, %115 : vector<8x256xf32>
    %118 = arith.divf %116, %117 : vector<8x256xf32>
    %119 = arith.mulf %113, %118 : vector<8x256xf32>
    %c17_i32_75 = arith.constant 17 : i32
    %120 = tpu.dynamic_rotate %119 by %c17_i32_75 dim 1 : vector<8x256xf32>, i32 -> vector<8x256xf32>
    %121 = vector.broadcast %14 : vector<1x256xf32> to vector<8x256xf32>
    %122 = arith.mulf %120, %121 : vector<8x256xf32>
    %c0_76 = arith.constant 0 : index
    %c0_77 = arith.constant 0 : index
    %123 = vector.load %arg19[%c0_76, %c0_77] : memref<72x256xf32, #tpu.memory_space<vmem>>, vector<8x256xf32>
    tpu.vector_store %arg19[%c0_76, %c0_77], %122 {strides = array<i32>} : memref<72x256xf32, #tpu.memory_space<vmem>>, vector<8x256xf32>,
    %c16_i32_78 = arith.constant 16 : i32
    %124 = tpu.dynamic_rotate %119 by %c16_i32_78 dim 1 : vector<8x256xf32>, i32 -> vector<8x256xf32>
    %125 = vector.broadcast %16 : vector<1x256xf32> to vector<8x256xf32>
    %126 = arith.mulf %124, %125 : vector<8x256xf32>
    %c8_79 = arith.constant 8 : index
    %c0_80 = arith.constant 0 : index
    %127 = vector.load %arg19[%c8_79, %c0_80] : memref<72x256xf32, #tpu.memory_space<vmem>>, vector<8x256xf32>
    tpu.vector_store %arg19[%c8_79, %c0_80], %126 {strides = array<i32>} : memref<72x256xf32, #tpu.memory_space<vmem>>, vector<8x256xf32>,
    %c15_i32_81 = arith.constant 15 : i32
    %128 = tpu.dynamic_rotate %119 by %c15_i32_81 dim 1 : vector<8x256xf32>, i32 -> vector<8x256xf32>
    %129 = vector.broadcast %18 : vector<1x256xf32> to vector<8x256xf32>
    %130 = arith.mulf %128, %129 : vector<8x256xf32>
    %c16_82 = arith.constant 16 : index
    %c0_83 = arith.constant 0 : index
    %131 = vector.load %arg19[%c16_82, %c0_83] : memref<72x256xf32, #tpu.memory_space<vmem>>, vector<8x256xf32>
    tpu.vector_store %arg19[%c16_82, %c0_83], %130 {strides = array<i32>} : memref<72x256xf32, #tpu.memory_space<vmem>>, vector<8x256xf32>,
    %c1_i32_84 = arith.constant 1 : i32
    %132 = tpu.dynamic_rotate %119 by %c1_i32_84 dim 1 : vector<8x256xf32>, i32 -> vector<8x256xf32>
    %133 = vector.broadcast %20 : vector<1x256xf32> to vector<8x256xf32>
    %134 = arith.mulf %132, %133 : vector<8x256xf32>
    %c24_85 = arith.constant 24 : index
    %c0_86 = arith.constant 0 : index
    %135 = vector.load %arg19[%c24_85, %c0_86] : memref<72x256xf32, #tpu.memory_space<vmem>>, vector<8x256xf32>
    tpu.vector_store %arg19[%c24_85, %c0_86], %134 {strides = array<i32>} : memref<72x256xf32, #tpu.memory_space<vmem>>, vector<8x256xf32>,
    %136 = vector.broadcast %22 : vector<1x256xf32> to vector<8x256xf32>
    %137 = arith.mulf %119, %136 : vector<8x256xf32>
    %c32_87 = arith.constant 32 : index
    %c0_88 = arith.constant 0 : index
    %138 = vector.load %arg19[%c32_87, %c0_88] : memref<72x256xf32, #tpu.memory_space<vmem>>, vector<8x256xf32>
    tpu.vector_store %arg19[%c32_87, %c0_88], %137 {strides = array<i32>} : memref<72x256xf32, #tpu.memory_space<vmem>>, vector<8x256xf32>,
    %c255_i32_89 = arith.constant 255 : i32
    %139 = tpu.dynamic_rotate %119 by %c255_i32_89 dim 1 : vector<8x256xf32>, i32 -> vector<8x256xf32>
    %140 = vector.broadcast %24 : vector<1x256xf32> to vector<8x256xf32>
    %141 = arith.mulf %139, %140 : vector<8x256xf32>
    %c40 = arith.constant 40 : index
    %c0_90 = arith.constant 0 : index
    %142 = vector.load %arg19[%c40, %c0_90] : memref<72x256xf32, #tpu.memory_space<vmem>>, vector<8x256xf32>
    tpu.vector_store %arg19[%c40, %c0_90], %141 {strides = array<i32>} : memref<72x256xf32, #tpu.memory_space<vmem>>, vector<8x256xf32>,
    %c241_i32_91 = arith.constant 241 : i32
    %143 = tpu.dynamic_rotate %119 by %c241_i32_91 dim 1 : vector<8x256xf32>, i32 -> vector<8x256xf32>
    %144 = vector.broadcast %26 : vector<1x256xf32> to vector<8x256xf32>
    %145 = arith.mulf %143, %144 : vector<8x256xf32>
    %c48 = arith.constant 48 : index
    %c0_92 = arith.constant 0 : index
    %146 = vector.load %arg19[%c48, %c0_92] : memref<72x256xf32, #tpu.memory_space<vmem>>, vector<8x256xf32>
    tpu.vector_store %arg19[%c48, %c0_92], %145 {strides = array<i32>} : memref<72x256xf32, #tpu.memory_space<vmem>>, vector<8x256xf32>,
    %c240_i32_93 = arith.constant 240 : i32
    %147 = tpu.dynamic_rotate %119 by %c240_i32_93 dim 1 : vector<8x256xf32>, i32 -> vector<8x256xf32>
    %148 = vector.broadcast %28 : vector<1x256xf32> to vector<8x256xf32>
    %149 = arith.mulf %147, %148 : vector<8x256xf32>
    %c56 = arith.constant 56 : index
    %c0_94 = arith.constant 0 : index
    %150 = vector.load %arg19[%c56, %c0_94] : memref<72x256xf32, #tpu.memory_space<vmem>>, vector<8x256xf32>
    tpu.vector_store %arg19[%c56, %c0_94], %149 {strides = array<i32>} : memref<72x256xf32, #tpu.memory_space<vmem>>, vector<8x256xf32>,
    %c239_i32_95 = arith.constant 239 : i32
    %151 = tpu.dynamic_rotate %119 by %c239_i32_95 dim 1 : vector<8x256xf32>, i32 -> vector<8x256xf32>
    %152 = vector.broadcast %30 : vector<1x256xf32> to vector<8x256xf32>
    %153 = arith.mulf %151, %152 : vector<8x256xf32>
    %c64 = arith.constant 64 : index
    %c0_96 = arith.constant 0 : index
    %154 = vector.load %arg19[%c64, %c0_96] : memref<72x256xf32, #tpu.memory_space<vmem>>, vector<8x256xf32>
    tpu.vector_store %arg19[%c64, %c0_96], %153 {strides = array<i32>} : memref<72x256xf32, #tpu.memory_space<vmem>>, vector<8x256xf32>,
    %c0_97 = arith.constant 0 : index
    %c0_98 = arith.constant 0 : index
    %155 = vector.load %arg19[%c0_97, %c0_98] : memref<72x256xf32, #tpu.memory_space<vmem>>, vector<72x256xf32>
    %cst_99 = arith.constant dense<0.000000e+00> : vector<8x256xf32>
    %156 = tpu.matmul %7, %155, %cst_99 {dimension_numbers = #tpu.dot_dimension_numbers<[1], [0], [0], [1], [0, 0, 1, 1], [], []>} : vector<8x72xf32>, vector<72x256xf32>, vector<8x256xf32> -> vector<8x256xf32>
    %157 = vector.broadcast %8 : vector<8x1xf32> to vector<8x256xf32>
    %158 = arith.addf %156, %157 : vector<8x256xf32>
    %cst_100 = arith.constant dense<0.000000e+00> : vector<8xf32>
    %159 = vector.multi_reduction <add>, %158, %cst_100 [1] : vector<8x256xf32> to vector<8xf32>
    %160 = vector.shape_cast %159 : vector<8xf32> to vector<8x1xf32>
    %cst_101 = arith.constant 2.560000e+02 : f32
    %161 = vector.broadcast %cst_101 : f32 to vector<8x1xf32>
    %162 = arith.divf %160, %161 : vector<8x1xf32>
    %cst_102 = arith.constant dense<0.000000e+00> : vector<8x1xf32>
    %163 = tpu.matmul %2, %162, %cst_102 {dimension_numbers = #tpu.dot_dimension_numbers<[1], [0], [0], [1], [0, 0, 1, 1], [], []>} : vector<8x8xf32>, vector<8x1xf32>, vector<8x1xf32> -> vector<8x1xf32>
    %164 = vector.broadcast %163 : vector<8x1xf32> to vector<8x256xf32>
    %165 = arith.subf %158, %164 : vector<8x256xf32>
    %166 = arith.mulf %165, %165 : vector<8x256xf32>
    %cst_103 = arith.constant dense<0.000000e+00> : vector<8xf32>
    %167 = vector.multi_reduction <add>, %166, %cst_103 [1] : vector<8x256xf32> to vector<8xf32>
    %168 = vector.shape_cast %167 : vector<8xf32> to vector<8x1xf32>
    %cst_104 = arith.constant 2.560000e+02 : f32
    %169 = vector.broadcast %cst_104 : f32 to vector<8x1xf32>
    %170 = arith.divf %168, %169 : vector<8x1xf32>
    %cst_105 = arith.constant dense<0.000000e+00> : vector<8x1xf32>
    %171 = tpu.matmul %2, %170, %cst_105 {dimension_numbers = #tpu.dot_dimension_numbers<[1], [0], [0], [1], [0, 0, 1, 1], [], []>} : vector<8x8xf32>, vector<8x1xf32>, vector<8x1xf32> -> vector<8x1xf32>
    %cst_106 = arith.constant 9.99999974E-6 : f32
    %172 = vector.broadcast %cst_106 : f32 to vector<8x1xf32>
    %173 = arith.addf %171, %172 : vector<8x1xf32>
    %174 = math.rsqrt %173 : vector<8x1xf32>
    %175 = arith.mulf %174, %9 : vector<8x1xf32>
    %176 = vector.broadcast %175 : vector<8x1xf32> to vector<8x256xf32>
    %177 = arith.mulf %165, %176 : vector<8x256xf32>
    %178 = vector.broadcast %10 : vector<8x1xf32> to vector<8x256xf32>
    %179 = arith.addf %177, %178 : vector<8x256xf32>
    %180 = arith.negf %179 : vector<8x256xf32>
    %181 = math.exp %180 : vector<8x256xf32>
    %cst_107 = arith.constant 1.000000e+00 : f32
    %182 = vector.broadcast %cst_107 : f32 to vector<8x256xf32>
    %183 = arith.addf %182, %181 : vector<8x256xf32>
    %184 = arith.divf %182, %183 : vector<8x256xf32>
    %185 = arith.mulf %179, %184 : vector<8x256xf32>
    %cst_108 = arith.constant dense<0.000000e+00> : vector<8x256xf32>
    %186 = tpu.matmul %11, %50, %cst_108 {dimension_numbers = #tpu.dot_dimension_numbers<[1], [0], [0], [1], [0, 0, 1, 1], [], []>} : vector<8x4xf32>, vector<4x256xf32>, vector<8x256xf32> -> vector<8x256xf32>
    %187 = vector.broadcast %12 : vector<8x1xf32> to vector<8x256xf32>
    %188 = arith.addf %186, %187 : vector<8x256xf32>
    %189 = arith.addf %185, %188 : vector<8x256xf32>
    %c0_109 = arith.constant 0 : index
    %c0_110 = arith.constant 0 : index
    %c0_111 = arith.constant 0 : index
    %190 = vector.load %arg17[%c0_109, %c0_110, %c0_111] : memref<1x8x256xf32, #tpu.memory_space<vmem>>, vector<1x8x256xf32>
    %191 = vector.shape_cast %190 : vector<1x8x256xf32> to vector<8x256xf32>
    %192 = vector.shape_cast %189 : vector<8x256xf32> to vector<1x8x256xf32>
    tpu.vector_store %arg17[%c0_109, %c0_110, %c0_111], %192 {strides = array<i32>} : memref<1x8x256xf32, #tpu.memory_space<vmem>>, vector<1x8x256xf32>,
    return
  }
  func.func @transform_0(%arg0: i32) -> (i32, i32, i32) {
    %c0_i32 = arith.constant 0 : i32
    %c0_i32_0 = arith.constant 0 : i32
    %c0_i32_1 = arith.constant 0 : i32
    return %arg0, %c0_i32, %c0_i32_0 : i32, i32, i32
  }
  func.func @transform_1(%arg0: i32) -> (i32, i32, i32) {
    %c0_i32 = arith.constant 0 : i32
    %c0_i32_0 = arith.constant 0 : i32
    %c0_i32_1 = arith.constant 0 : i32
    return %arg0, %c0_i32, %c0_i32_0 : i32, i32, i32
  }
  func.func @transform_2(%arg0: i32) -> (i32, i32) {
    %c0_i32 = arith.constant 0 : i32
    %c0_i32_0 = arith.constant 0 : i32
    %c0_i32_1 = arith.constant 0 : i32
    return %c0_i32, %c0_i32_0 : i32, i32
  }
  func.func @transform_3(%arg0: i32) -> (i32, i32) {
    %c0_i32 = arith.constant 0 : i32
    %c0_i32_0 = arith.constant 0 : i32
    %c0_i32_1 = arith.constant 0 : i32
    return %c0_i32, %c0_i32_0 : i32, i32
  }
  func.func @transform_4(%arg0: i32) -> (i32, i32, i32) {
    %c0_i32 = arith.constant 0 : i32
    %c0_i32_0 = arith.constant 0 : i32
    %c0_i32_1 = arith.constant 0 : i32
    %c0_i32_2 = arith.constant 0 : i32
    return %c0_i32, %c0_i32_0, %c0_i32_1 : i32, i32, i32
  }
  func.func @transform_5(%arg0: i32) -> (i32, i32) {
    %c0_i32 = arith.constant 0 : i32
    %c0_i32_0 = arith.constant 0 : i32
    %c0_i32_1 = arith.constant 0 : i32
    return %c0_i32, %c0_i32_0 : i32, i32
  }
  func.func @transform_6(%arg0: i32) -> (i32, i32) {
    %c0_i32 = arith.constant 0 : i32
    %c0_i32_0 = arith.constant 0 : i32
    %c0_i32_1 = arith.constant 0 : i32
    return %c0_i32, %c0_i32_0 : i32, i32
  }
  func.func @transform_7(%arg0: i32) -> (i32, i32) {
    %c0_i32 = arith.constant 0 : i32
    %c0_i32_0 = arith.constant 0 : i32
    %c0_i32_1 = arith.constant 0 : i32
    return %c0_i32, %c0_i32_0 : i32, i32
  }
  func.func @transform_8(%arg0: i32) -> (i32, i32) {
    %c0_i32 = arith.constant 0 : i32
    %c0_i32_0 = arith.constant 0 : i32
    %c0_i32_1 = arith.constant 0 : i32
    return %c0_i32, %c0_i32_0 : i32, i32
  }
  func.func @transform_9(%arg0: i32) -> (i32, i32) {
    %c0_i32 = arith.constant 0 : i32
    %c0_i32_0 = arith.constant 0 : i32
    %c0_i32_1 = arith.constant 0 : i32
    return %c0_i32, %c0_i32_0 : i32, i32
  }
  func.func @transform_10(%arg0: i32) -> (i32, i32) {
    %c0_i32 = arith.constant 0 : i32
    %c0_i32_0 = arith.constant 0 : i32
    %c0_i32_1 = arith.constant 0 : i32
    return %c0_i32, %c0_i32_0 : i32, i32
  }
  func.func @transform_11(%arg0: i32) -> (i32, i32) {
    %c0_i32 = arith.constant 0 : i32
    %c0_i32_0 = arith.constant 0 : i32
    %c0_i32_1 = arith.constant 0 : i32
    return %c0_i32, %c0_i32_0 : i32, i32
  }
  func.func @transform_12(%arg0: i32) -> (i32, i32) {
    %c0_i32 = arith.constant 0 : i32
    %c0_i32_0 = arith.constant 0 : i32
    %c0_i32_1 = arith.constant 0 : i32
    return %c0_i32, %c0_i32_0 : i32, i32
  }
  func.func @transform_13(%arg0: i32) -> (i32, i32) {
    %c0_i32 = arith.constant 0 : i32
    %c0_i32_0 = arith.constant 0 : i32
    %c0_i32_1 = arith.constant 0 : i32
    return %c0_i32, %c0_i32_0 : i32, i32
  }
  func.func @transform_14(%arg0: i32) -> (i32, i32) {
    %c0_i32 = arith.constant 0 : i32
    %c0_i32_0 = arith.constant 0 : i32
    %c0_i32_1 = arith.constant 0 : i32
    return %c0_i32, %c0_i32_0 : i32, i32
  }
  func.func @transform_15(%arg0: i32) -> (i32, i32) {
    %c0_i32 = arith.constant 0 : i32
    %c0_i32_0 = arith.constant 0 : i32
    %c0_i32_1 = arith.constant 0 : i32
    return %c0_i32, %c0_i32_0 : i32, i32
  }
  func.func @transform_16(%arg0: i32) -> (i32, i32, i32) {
    %c0_i32 = arith.constant 0 : i32
    %c0_i32_0 = arith.constant 0 : i32
    %c0_i32_1 = arith.constant 0 : i32
    return %arg0, %c0_i32, %c0_i32_0 : i32, i32, i32
  }
}

</mosaic_0001>

<bundles_post_ra>
// kernel: tpu_custom_call.1
= control target key start
LH: loop header
LB: loop body
LE: loop exit
PB: predicated region body
PF: predicated region fallthrough
CT: control target
= control target key end

     0   :  { %s2429_s0 = inlined_call_operand.vmem [shape: bf16[2,4,256], index: 0, kind: input, shape index: {}]   ;;  %s2430_s1 = inlined_call_operand.vmem [shape: f32[2,1,24], index: 1, kind: input, shape index: {}]   ;;  %s2431_s2 = inlined_call_operand.vmem [shape: f32[16,24], index: 2, kind: input, shape index: {}]   ;;  %s2432_s3 = inlined_call_operand.vmem [shape: f32[16,1], index: 3, kind: input, shape index: {}]   ;;  %s2433_s4 = inlined_call_operand.vmem [shape: f32[9,1,256], index: 4, kind: input, shape index: {}]   ;;  %s2434_s5 = inlined_call_operand.vmem [shape: f32[8,36], index: 5, kind: input, shape index: {}]   ;;  %s2435_s6 = inlined_call_operand.vmem [shape: f32[8,1], index: 6, kind: input, shape index: {}]   ;;  %s2436_s7 = inlined_call_operand.vmem [shape: f32[8,1], index: 7, kind: input, shape index: {}]   ;;  %s2437_s8 = inlined_call_operand.vmem [shape: f32[8,1], index: 8, kind: input, shape index: {}]   ;;  %s2438_s9 = inlined_call_operand.vmem [shape: f32[8,8], index: 9, kind: input, shape index: {}]   ;;  %s2439_s10 = inlined_call_operand.vmem [shape: f32[8,72], index: 10, kind: input, shape index: {}]   ;;  %s2440_s11 = inlined_call_operand.vmem [shape: f32[8,1], index: 11, kind: input, shape index: {}]   ;;  %s2441_s12 = inlined_call_operand.vmem [shape: f32[8,1], index: 12, kind: input, shape index: {}]   ;;  %s2442_s13 = inlined_call_operand.vmem [shape: f32[8,1], index: 13, kind: input, shape index: {}]   ;;  %s2443_s14 = inlined_call_operand.vmem [shape: f32[8,4], index: 14, kind: input, shape index: {}]   ;;  %s2444_s15 = inlined_call_operand.vmem [shape: f32[8,1], index: 15, kind: input, shape index: {}]   ;;  %s2445_s16 = inlined_call_operand.hbm [shape: f32[2,8,256], index: 16, kind: output, shape index: {}]  }
   0x1   :  { %2465 = sst [smem:[#allocation10_spill]] %s2429_s0 }
   0x2   :  { %2466 = sst [smem:[#allocation11_spill]] %s2430_s1 }
   0x3   :  { %2467 = sst [smem:[#allocation12_spill]] %s2431_s2 }
   0x4   :  { %21 = vsyncpa [#allocation5], 0 }
   0x5   :  { %23 = vsyncpa [#allocation5 + $0x1], 0  ;;  %s2017_s21 = smov 0   ;;  %s2019_s22 = smov 0  }
   0x6   :  { %s2021_s23 = smov 0   ;;  %s2023_s24 = smov 0  }
   0x7 LB: > { %2468 = sst [smem:[#allocation7_spill]] %s1914_s23  ;;  %s2038_s25 = sadd.s32 4294967295, %s1918_s24   ;;  %s1918_s24 = sphi %s2023_s24, %s2484_s24   ;;  %s1914_s23 = sphi %s2021_s23, %s2489_s23   ;;  %s1910_s22 = sphi %s2019_s22, %s2488_s22   ;;  %s1906_s21 = sphi %s2017_s21, %s2487_s21  }
   0x8   : > { %s1650_s26 = sadd.s32 4294967294, %s1918_s24   ;;  %s2042_s27 = sadd.s32 1, %s1918_s24  }
   0x9   : > { %2469 = sst [smem:[#allocation8_spill]] %s2042_s27  ;;  %s382_s28 = sadd.s32 1, %s1914_s23 }
   0xa   : > { %s379_s29 = ssub.s32 %s1918_s24, %s2042_s27  ;;  %p392_p0 = scmp.ne.s32.totalorder %s1914_s23, %s1910_s22 }
   0xb   : > { %p380_p1 = scmp.eq.s32.totalorder %s379_s29, 0  ;;  %p393_p2 = scmp.eq.s32.totalorder %s2038_s25, 1 }
   0xc   : > { %p398_p3 = scmp.ne.s32.totalorder %s1910_s22, %s1906_s21  ;;  %p399_p4 = scmp.eq.s32.totalorder %s1650_s26, 1 }
   0xd   : > { %s2053_s30 = scalar_select %p380_p1, %s1914_s23, %s382_s28  }
   0xe   : > { %p2055_p5 = por %p393_p2, %p392_p0  ;;  %p2059_p6 = por %p399_p4, %p398_p3 }
   0xf   : > { %2470 = sst [smem:[#allocation9_spill]] %s2053_s30  ;;  %p1653_p7 = scmp.ge.s32.totalorder %s1918_s24, 1 }
  0x10   : > { %p473_p8 = scmp.lt.s32.totalorder %s1918_s24, 3 }
  0x12   : > { %p474_p9 = pnand %p1653_p7, %p473_p8 }
  0x13   : > { %p526_p10 = scmp.lt.s32.totalorder (!%p474_p9), %s2038_s25, 1  ;;  %v575_v0 = vlaneseq (!%p474_p9)  ;;  %s2473_s28 = sld [smem:[#allocation10_spill]] (!%p474_p9)  ;;  %v1660_v6 = vld [vmem:[%s2433_s4 + $0x8] sm:$0x3] (!%p474_p9)  ;;  %v1928_v14 = vmov (!%p474_p9), 0.0   ;;  %v540_v15 = vld [vmem:[%s2435_s6] sm:$0xff] (!%p474_p9) }
  0x14   : > { %477 = sbr.rel (%p474_p9) target bundleno = 2835 (0xb13), region = 84  ;;  %s2461_s23 = smov (!%p474_p9), 17   ;;  %906 = vmatprep.mubr.f32.mxu0 (!%p474_p9), %v1928_v14  ;;  %1696 = vmatprep.subr.mxu1 (!%p474_p9), %v1928_v14  ;;  %v1929_v16 = vmov (!%p474_p9), 0   ;;  %v1657_v18 = vld [vmem:[%s2433_s4 + $0x2] sm:$0x3] (!%p474_p9)  ;;  %vm835_vm8 = vcmask (!%p474_p9), 1043456  }
  0x15   : > { %v576_v1 = vshrl.u32 (!%p474_p9), %v575_v0, 7  ;;  %s2449_s30 = smov (!%p474_p9), 1   ;;  %s2451_s20 = smov (!%p474_p9), 15   ;;  %1830 = vset.pattern.permute.xlu0 (!%p474_p9), %v1929_v16  ;;  %1831 = vset.pattern.permute.xlu1 (!%p474_p9), %v1929_v16  ;;  %v2110_v17 = vand.u32 (!%p474_p9), 127, %v575_v0  ;;  %v549_v19 = vld [vmem:[%s2433_s4] sm:$0x3] (!%p474_p9) }
  0x16   : > { %s2459_s26 = smov (!%p474_p9), 127   ;;  %v1659_v20 = vld [vmem:[%s2433_s4 + $0x6] sm:$0x3] (!%p474_p9)  ;;  %v1658_v21 = vld [vmem:[%s2433_s4 + $0x4] sm:$0x3] (!%p474_p9)  ;;  %vm831_vm9 = vcmask (!%p474_p9), 293888  }
  0x17   : > { %v2073_v3 = vsub.s32 (!%p474_p9), 0, %v576_v1  ;;  %v2075_v4 = vsub.s32 (!%p474_p9), 1, %v576_v1  ;;  %vm625_vm0 = vcmp.lt.s32.totalorder (!%p474_p9), %v2110_v17, 16  ;;  %vm603_vm1 = vcmp.lt.s32.totalorder (!%p474_p9), %v2110_v17, 17  ;;  %v1661_v22 = vld [vmem:[%s2433_s4 + $0xa] sm:$0x3] (!%p474_p9) }
  0x18   : > { %vm675_vm2 = vcmp.lt.s32.totalorder (!%p474_p9), %v2110_v17, 1  ;;  %vm653_vm3 = vcmp.lt.s32.totalorder (!%p474_p9), %v2110_v17, 15  ;;  %v1663_v30 = vld [vmem:[%s2433_s4 + $0xe] sm:$0x3] (!%p474_p9)  ;;  %v1662_v31 = vld [vmem:[%s2433_s4 + $0xc] sm:$0x3] (!%p474_p9) }
  0x19   : > { %v2083_v7 = vrot.slane (!%p474_p9), %v1660_v6, %v2073_v3  ;;  %v2086_v8 = vrot.slane (!%p474_p9), %v1660_v6, %v2075_v4  ;;  %v2131_v23 = vrot.slane (!%p474_p9), %v1657_v18, %v2073_v3  ;;  %v2134_v24 = vrot.slane (!%p474_p9), %v1657_v18, %v2075_v4  ;;  %v1664_v1 = vld [vmem:[%s2433_s4 + $0x10] sm:$0x3] (!%p474_p9)  ;;  %s2474_s1 = sld [smem:[#allocation11_spill]] (!%p474_p9)  ;;  %s2475_s2 = sld [smem:[#allocation12_spill]] (!%p474_p9) }
  0x1a   : > { %v2137_v25 = vrot.slane (!%p474_p9), %v549_v19, %v2073_v3  ;;  %v2140_v26 = vrot.slane (!%p474_p9), %v549_v19, %v2075_v4  ;;  %v2143_v27 = vrot.slane (!%p474_p9), %v1659_v20, %v2073_v3  ;;  %v2146_v28 = vrot.slane (!%p474_p9), %v1659_v20, %v2075_v4  ;;  %s2476_s27 = smov (!%p474_p9), 17  }
  0x1b   : > { %s2067_s18 = scalar_select %p526_p10, %s2038_s25, 1  ;;  %v708_v10 = vcombine.low %v2083_v7, %v2086_v8  ;;  %v2150_v29 = vrot.slane %v1658_v21, %v2073_v3  ;;  %v2159_v34 = vrot.slane %v1658_v21, %v2075_v4  ;;  %vm720_vm4 = vcmp.lt.s32.totalorder %v2110_v17, 127 }
  0x1c   : > { %v2163_v35 = vrot.slane %v1661_v22, %v2073_v3  ;;  %v2166_v36 = vrot.slane %v1661_v22, %v2075_v4  ;;  %vm770_vm5 = vcmp.lt.s32.totalorder %v2110_v17, 112  ;;  %v2170_v41 = vrot.slane %v1663_v30, %v2073_v3 }
  0x1d   : > { %s1686_s19 = sshll.u32 %s2067_s18, 2  ;;  %v2173_v42 = vrot.slane %v1663_v30, %v2075_v4  ;;  %v2176_v43 = vrot.slane %v1662_v31, %v2073_v3  ;;  %vm748_vm6 = vcmp.lt.s32.totalorder %v2110_v17, 113  ;;  %v2192_v60 = vrot.slane %v1662_v31, %v2075_v4 }
  0x1e   : > { %s530_s29 = scalar_lea.vmem %s2473_s28, %s1686_s19  ;;  %s2447_s19 = smov 16   ;;  %vm798_vm7 = vcmp.lt.s32.totalorder %v2110_v17, 111  ;;  %v2211_v22 = vrot.slane %v1664_v1, %v2073_v3  ;;  %v2214_v30 = vrot.slane %v1664_v1, %v2075_v4  ;;  %vm1930_vm10 = vmmov 0  }
  0x1f   : > { %v592_v2 = vld [vmem:[%s530_s29] sm:$0xf]  ;;  %s2453_s28 = smov 112   ;;  %s2455_s29 = smov 113   ;;  %1698 = vmatprep.mubr.msk.f32.mxu1 %vm1930_vm10, %v1928_v14  ;;  %vm921_vm11 = vcmask 64512   ;;  %vm582_vm12 = vcmask 195584  }
  0x20   : > { %v2077_v5 = vunpack.c.l.bf16 %v592_v2  ;;  %vm1217_vm13 = vcmask 588800   ;;  %vm1484_vm14 = vcmask 31744  }
  0x22   : > { %v2090_v9 = vcombine.high %v2077_v5, %v2077_v5  ;;  %v710_v12 = vmul.f32 %v708_v10, %v2077_v5 }
  0x24   : > { %v1790_v11 = vpack.i.bf16 %v2090_v9, %v2077_v5  ;;  %v712_v13 = vcombine.high %v710_v12, %v710_v12  ;;  %714 = vst [vmem:[#allocation2 + $0x20] sm:$0xf] %v710_v12 }
  0x26   : > { %1791 = vrot.lane.b32.xlu0 %v1790_v11, %s2447_s19  ;;  %1801 = vrot.lane.b32.xlu1 %v1790_v11, %s2461_s23  ;;  %715 = vst [vmem:[#allocation2 + $0x28] sm:$0xf] %v712_v13  ;;  %s2457_s19 = smov 111   ;;  %s2479_s23 = smov 1  }
  0x2a   : > { %1796 = vrot.lane.b32.xlu0 %v1790_v11, %s2449_s30  ;;  %1806 = vrot.lane.b32.xlu1 %v1790_v11, %s2451_s20  ;;  %s533_s30 = scalar_lea.vmem %s2474_s1, %s2067_s18  ;;  %s2477_s18 = smov 16  }
  0x2b   : > { %s2482_s20 = smov 112  }
  0x2e   : > { %1811 = vrot.lane.b32.xlu0 %v1790_v11, %s2459_s26  ;;  %1816 = vrot.lane.b32.xlu1 %v1790_v11, %s2453_s28  ;;  %s2480_s26 = smov 127   ;;  %s2483_s28 = smov 111  }
  0x32   : > { %1821 = vrot.lane.b32.xlu0 %v1790_v11, %s2455_s29  ;;  %1826 = vrot.lane.b32.xlu1 %v1790_v11, %s2457_s19  ;;  %s2478_s19 = smov 15  }
  0x36   : > { %828 = vperm.xlu0 %1830, %v540_v15  }
  0x98   : > { %v1792_v32 = vpop.permute.xlu0 %1791  ;;  %v1802_v33 = vpop.permute.xlu1 %1801 }
  0x99   : > { %v1794_v37 = vunpack.i.h.bf16 %v1792_v32  ;;  %v1793_v38 = vunpack.i.l.bf16 %v1792_v32  ;;  %v1804_v39 = vunpack.i.h.bf16 %v1802_v33  ;;  %v1803_v40 = vunpack.i.l.bf16 %v1802_v33 }
  0x9b   : > { %v626_v44 = vsel %vm625_vm0, %v1793_v38, %v1794_v37  ;;  %v627_v45 = vsel %vm625_vm0, %v1794_v37, %v1793_v38  ;;  %v604_v46 = vsel %vm603_vm1, %v1803_v40, %v1804_v39  ;;  %v605_v47 = vsel %vm603_vm1, %v1804_v39, %v1803_v40 }
  0x9c   : > { %v639_v48 = vmul.f32 %v2131_v23, %v627_v45  ;;  %v640_v49 = vmul.f32 %v2134_v24, %v626_v44  ;;  %v617_v50 = vmul.f32 %v2137_v25, %v605_v47  ;;  %v618_v51 = vmul.f32 %v2140_v26, %v604_v46  ;;  %v1797_v52 = vpop.permute.xlu0 %1796  ;;  %v1807_v53 = vpop.permute.xlu1 %1806 }
  0x9d   : > { %v1799_v54 = vunpack.i.h.bf16 %v1797_v52  ;;  %v1798_v55 = vunpack.i.l.bf16 %v1797_v52  ;;  %v1809_v56 = vunpack.i.h.bf16 %v1807_v53  ;;  %v1808_v57 = vunpack.i.l.bf16 %v1807_v53 }
  0x9e   : > { %v643_v58 = vrot.slane %v639_v48, 4  ;;  %v644_v59 = vrot.slane %v640_v49, 4  ;;  %619 = vst [vmem:[#allocation2] sm:$0xf] %v617_v50  ;;  %620 = vst [vmem:[#allocation2 + $0x8] sm:$0xf] %v618_v51 }
  0x9f   : > { %v676_v61 = vsel %vm675_vm2, %v1798_v55, %v1799_v54  ;;  %v677_v62 = vsel %vm675_vm2, %v1799_v54, %v1798_v55  ;;  %v654_v63 = vsel %vm653_vm3, %v1808_v57, %v1809_v56  ;;  %v655_v0 = vsel %vm653_vm3, %v1809_v56, %v1808_v57 }
  0xa0   : > { %647 = vst [vmem:[#allocation2] sm:$0xf0] %v643_v58  ;;  %648 = vst [vmem:[#allocation2 + $0x8] sm:$0xf0] %v644_v59  ;;  %v689_v2 = vmul.f32 %v2143_v27, %v677_v62  ;;  %v690_v6 = vmul.f32 %v2146_v28, %v676_v61  ;;  %v667_v10 = vmul.f32 %v2150_v29, %v655_v0  ;;  %v1812_v12 = vpop.permute.xlu0 %1811  ;;  %v1817_v13 = vpop.permute.xlu1 %1816 }
  0xa1   : > { %v668_v11 = vmul.f32 %v2159_v34, %v654_v63  ;;  %v1814_v15 = vunpack.i.h.bf16 %v1812_v12  ;;  %v1813_v16 = vunpack.i.l.bf16 %v1812_v12  ;;  %v1819_v18 = vunpack.i.h.bf16 %v1817_v13 }
  0xa2   : > { %v1818_v19 = vunpack.i.l.bf16 %v1817_v13  ;;  %v693_v20 = vrot.slane %v689_v2, 4  ;;  %v694_v21 = vrot.slane %v690_v6, 4  ;;  %669 = vst [vmem:[#allocation2 + $0x10] sm:$0xf] %v667_v10 }
  0xa3   : > { %670 = vst [vmem:[#allocation2 + $0x18] sm:$0xf] %v668_v11  ;;  %v721_v31 = vsel %vm720_vm4, %v1813_v16, %v1814_v15  ;;  %v722_v32 = vsel %vm720_vm4, %v1814_v15, %v1813_v16 }
  0xa4   : > { %v771_v33 = vsel %vm770_vm5, %v1818_v19, %v1819_v18  ;;  %v772_v37 = vsel %vm770_vm5, %v1819_v18, %v1818_v19  ;;  %697 = vst [vmem:[#allocation2 + $0x10] sm:$0xf0] %v693_v20  ;;  %698 = vst [vmem:[#allocation2 + $0x18] sm:$0xf0] %v694_v21  ;;  %v734_v38 = vmul.f32 %v2163_v35, %v721_v31  ;;  %v1822_v44 = vpop.permute.xlu0 %1821  ;;  %v1827_v45 = vpop.permute.xlu1 %1826  ;;  %v539_v21 = vld [vmem:[%s2434_s5] sm:$0xff] }
  0xa5   : > { %v735_v39 = vmul.f32 %v2166_v36, %v722_v32  ;;  %v784_v4 = vmul.f32 %v2170_v41, %v771_v33  ;;  %v785_v40 = vmul.f32 %v2173_v42, %v772_v37  ;;  %v1824_v46 = vunpack.i.h.bf16 %v1822_v44 }
  0xa6   : > { %v1823_v47 = vunpack.i.l.bf16 %v1822_v44  ;;  %v1829_v48 = vunpack.i.h.bf16 %v1827_v45  ;;  %v1828_v49 = vunpack.i.l.bf16 %v1827_v45  ;;  %v738_v50 = vrot.slane %v734_v38, 4  ;;  %v2253_v44 = vld [vmem:[%s2438_s9] sm:$0xff] }
  0xa7   : > { %v739_v51 = vrot.slane %v735_v39, 4  ;;  %v788_v52 = vrot.slane %v784_v4, 4  ;;  %v789_v53 = vrot.slane %v785_v40, 4  ;;  %v817_v63 = vld [vmem:[#allocation2 + $0x8] sm:$0xff]  ;;  %v816_v1 = vld [vmem:[#allocation2] sm:$0xff] }
  0xa8   : > { %v749_v54 = vsel %vm748_vm6, %v1823_v47, %v1824_v46  ;;  %v750_v55 = vsel %vm748_vm6, %v1824_v46, %v1823_v47  ;;  %v799_v56 = vsel %vm798_vm7, %v1828_v49, %v1829_v48  ;;  %v800_v57 = vsel %vm798_vm7, %v1829_v48, %v1828_v49  ;;  %742 = vst [vmem:[#allocation2 + $0x20] sm:$0xf0] %v738_v50 }
  0xa9   : > { %743 = vst [vmem:[#allocation2 + $0x28] sm:$0xf0] %v739_v51  ;;  %792 = vst [vmem:[#allocation2 + $0x30] sm:$0xf0] %v788_v52  ;;  %v762_v58 = vmul.f32 %v2176_v43, %v749_v54  ;;  %v763_v59 = vmul.f32 %v2192_v60, %v750_v55  ;;  %v812_v61 = vmul.f32 %v2211_v22, %v799_v56 }
  0xaa   : > { %793 = vst [vmem:[#allocation2 + $0x38] sm:$0xf0] %v789_v53  ;;  %v813_v62 = vmul.f32 %v2214_v30, %v800_v57  ;;  %v566_v53 = vld [vmem:[%s533_s30] sm:$0x1]  ;;  %s2481_s30 = smov 113  }
  0xab   : > { %764 = vst [vmem:[#allocation2 + $0x30] sm:$0xf] %v762_v58  ;;  %765 = vst [vmem:[#allocation2 + $0x38] sm:$0xf] %v763_v59  ;;  %v819_v0 = vld [vmem:[#allocation2 + $0x18] sm:$0xff]  ;;  %v818_v2 = vld [vmem:[#allocation2 + $0x10] sm:$0xff] }
  0xac   : > { %814 = vst [vmem:[#allocation2 + $0x40] sm:$0xf] %v812_v61  ;;  %815 = vst [vmem:[#allocation2 + $0x48] sm:$0xf] %v813_v62  ;;  %v1716_v6 = vpack.c.bf16 %v819_v0, %v817_v63  ;;  %v1718_v10 = vpack.c.bf16 %v818_v2, %v816_v1  ;;  %v1665_v54 = vmul.f32 -1.442695, %v566_v53 }
  0xad   : > { %v534_v59 = vld [vmem:[%s2475_s2] sm:$0xff]  ;;  %v535_v61 = vld [vmem:[%s2475_s2 + $0x8] sm:$0xff] }
  0xae   : > { %1717 = vmatprep.subr.bf16.mxu0 %v1716_v6  ;;  %1832 = vpow2.f32 %v1665_v54 }
  0xaf   : > { %1719 = vmatpush1.bf16.msra.mxu0 %v1718_v10  ;;  %v820_v13 = vld [vmem:[#allocation2 + $0x20] sm:$0xff] }
  0xb0   : > { %v821_v11 = vld [vmem:[#allocation2 + $0x28] sm:$0xff] }
  0xb2   : > { %v823_v12 = vld [vmem:[#allocation2 + $0x38] sm:$0xff]  ;;  %v822_v15 = vld [vmem:[#allocation2 + $0x30] sm:$0xff] }
  0xb3   : > { %v1720_v16 = vpack.c.bf16 %v823_v12, %v821_v11  ;;  %v1722_v18 = vpack.c.bf16 %v822_v15, %v820_v13  ;;  %v825_v19 = vld [vmem:[#allocation2 + $0x48] sm:$0xf]  ;;  %v824_v20 = vld [vmem:[#allocation2 + $0x40] sm:$0xf] }
  0xb4   : > { %v536_v11 = vld [vmem:[%s2432_s3] sm:$0xff]  ;;  %v537_v15 = vld [vmem:[%s2432_s3 + $0x8] sm:$0xff] }
  0xb5   : > { %1721 = vmatprep.subr.bf16.mxu0 %v1720_v16  ;;  %v829_v31 = vpop.permute.xlu0 %828  ;;  %v542_v13 = vld [vmem:[%s2437_s8] sm:$0xff] }
  0xb6   : > { %1723 = vmatpush1.bf16.msra.mxu0 %v1722_v18 }
  0xb7   : > { %1666 = vmatprep.subr.msk.mxu0 %vm835_vm8, %v825_v19 }
  0xb8   : > { %v1833_v55 = vpop.eup %1832 }
  0xb9   : > { %v570_v56 = vadd.f32 1.0, %v1833_v55 }
  0xba   : > { %1667 = vmatpush1.msk.msra.mxu0 %vm835_vm8, %v824_v20 }
  0xbb   : > { %1668 = vmatmul.mubr.msk.f32.vlgmr.msra.gmra.mrb[0].mxu0 %vm831_vm9, %v539_v21  ;;  %1706 = vmatprep.subr.mxu0 %v1928_v14  ;;  %1834 = vrcp.f32 %v570_v56 }
  0xbc   : > { %1708 = vmatprep.mubr.msk.f32.mxu0 %vm1930_vm10, %v1928_v14 }
  0xc5   : > { %v1835_v57 = vpop.eup %1834 }
  0xc6   : > { %v573_v58 = vmul.f32 %v1835_v57, %v566_v53 }
  0xc8   : > { %v578_v62 = vrot.slane %v573_v58, %v2073_v3 }
  0xca   : > { %v580_v63 = vmul.f32 %v578_v62, %v534_v59  ;;  %v581_v0 = vmul.f32 %v578_v62, %v535_v61 }
  0xcc   : > { %v583_v1 = vsel %vm582_vm12, %v580_v63, 0.0  ;;  %v586_v2 = vsel %vm582_vm12, %v581_v0, 0.0 }
 0x18e   : > { %v908_v32 = vpop.f32.mrb[0].mxu0 }
 0x18f   : > { %v909_v33 = vadd.f32 %v908_v32, %v829_v31  ;;  %v910_v37 = vpop.f32.mrb[1].mxu0 }
 0x190   : > { %v911_v38 = vadd.f32 %v910_v37, %v829_v31  ;;  %v541_v37 = vld [vmem:[%s2436_s7] sm:$0xff] }
 0x192   : > { %v916_v39 = vadd.f32 %v911_v38, %v909_v33 }
 0x194   : > { %917 = vadd.xlane.f32.xlu1 %v916_v39 }
 0x198   : > { %584 = vadd.xlane.f32.xlu1 %v583_v1 }
 0x19c   : > { %587 = vadd.xlane.f32.xlu1 %v586_v2 }
 0x221   : > { %v918_v4 = vpop.xlane.xlu1 %917 }
 0x222   : > { %v920_v40 = vmul.f32 0.00390625, %v918_v4 }
 0x224   : > { %1697 = vmatpush3.msra.mxu1 %v920_v40 }
 0x225   : > { %1699 = vmatmul.mubr.msk.f32.vlgmr.msra.gmra.mrb[0].mxu1 %vm921_vm11, %v2253_v44  ;;  %1701 = vmatprep.subr.mxu1 %v1928_v14  ;;  %v585_v3 = vpop.xlane.xlu1 %584 }
 0x226   : > { %1703 = vmatprep.mubr.msk.f32.mxu1 %vm1930_vm10, %v1928_v14  ;;  %v589_v12 = vadd.f32 %v585_v3, %v536_v11 }
 0x228   : > { %v591_v16 = vadd.f32 1.0, %v589_v12 }
 0x229   : > { %v588_v18 = vpop.xlane.xlu1 %587 }
 0x22a   : > { %v914_v19 = vmul.f32 %v591_v16, %v542_v13  ;;  %v590_v20 = vadd.f32 %v588_v18, %v537_v15 }
 0x22c   : > { %v915_v21 = vadd.f32 %v914_v19, %v590_v20 }
 0x22e   : > { %1089 = vperm.xlu1 %1831, %v915_v21  }
 0x2f8   : > { %v991_v45 = vpop.f32.mrb[0].mxu1 }
 0x2f9   : > { %997 = vperm.xlu0 %1830, %v991_v45   ;;  %v1700_v46 = vpop.f32.mrb[1].mxu1 }
 0x378   : > { %v998_v47 = vpop.permute.xlu0 %997 }
 0x379   : > { %v1000_v48 = vsub.f32 %v909_v33, %v998_v47  ;;  %v1001_v49 = vsub.f32 %v911_v38, %v998_v47  ;;  %v913_v38 = vmul.f32 %v591_v16, %v541_v37  ;;  %v1090_v47 = vpop.permute.xlu1 %1089 }
 0x37b   : > { %v1002_v50 = vmul.f32 %v1000_v48, %v1000_v48  ;;  %v1003_v51 = vmul.f32 %v1001_v49, %v1001_v49 }
 0x37d   : > { %v1004_v52 = vadd.f32 %v1003_v51, %v1002_v50 }
 0x37f   : > { %1005 = vadd.xlane.f32.xlu0 %v1004_v52 }
 0x40c   : > { %v1006_v6 = vpop.xlane.xlu0 %1005 }
 0x40d   : > { %v1007_v10 = vmul.f32 0.00390625, %v1006_v6 }
 0x40f   : > { %1702 = vmatpush3.msra.mxu1 %v1007_v10 }
 0x410   : > { %1704 = vmatmul.mubr.msk.f32.vlgmr.msra.gmra.mrb[2].mxu1 %vm921_vm11, %v2253_v44 }
 0x411   : > { %1285 = vmatprep.mubr.f32.mxu1 %v1928_v14 }
 0x4e3   : > { %v1074_v31 = vpop.f32.mrb[2].mxu1 }
 0x4e4   : > { %v1075_v32 = vadd.f32 1e-05, %v1074_v31  ;;  %v1705_v33 = vpop.f32.mrb[3].mxu1 }
 0x4e6   : > { %1836 = vrsqrt.f32 %v1075_v32 }
 0x4f0   : > { %v1837_v39 = vpop.eup %1836 }
 0x4f1   : > { %v1079_v4 = vmul.f32 %v1837_v39, %v913_v38 }
 0x4f3   : > { %1082 = vperm.xlu0 %1830, %v1079_v4  }
 0x572   : > { %v1083_v40 = vpop.permute.xlu0 %1082 }
 0x573   : > { %v1085_v45 = vmul.f32 %v1083_v40, %v1000_v48  ;;  %v1086_v46 = vmul.f32 %v1083_v40, %v1001_v49  ;;  %v544_v48 = vld [vmem:[%s2440_s11] sm:$0xff] }
 0x575   : > { %v1092_v50 = vadd.f32 %v1090_v47, %v1085_v45  ;;  %v1093_v51 = vadd.f32 %v1090_v47, %v1086_v46 }
 0x577   : > { %v1671_v52 = vmul.f32 -1.442695, %v1092_v50  ;;  %v1672_v53 = vmul.f32 -1.442695, %v1093_v51 }
 0x579   : > { %1838 = vpow2.f32 %v1671_v52 }
 0x57a   : > { %1840 = vpow2.f32 %v1672_v53 }
 0x583   : > { %v1839_v54 = vpop.eup %1838 }
 0x584   : > { %v1841_v55 = vpop.eup %1840  ;;  %v1100_v56 = vadd.f32 1.0, %v1839_v54 }
 0x585   : > { %v1101_v57 = vadd.f32 1.0, %v1841_v55 }
 0x586   : > { %1842 = vrcp.f32 %v1100_v56 }
 0x587   : > { %1844 = vrcp.f32 %v1101_v57 }
 0x590   : > { %v1843_v58 = vpop.eup %1842 }
 0x591   : > { %v1845_v59 = vpop.eup %1844  ;;  %v1106_v61 = vmul.f32 %v1843_v58, %v1092_v50 }
 0x592   : > { %v1107_v62 = vmul.f32 %v1845_v59, %v1093_v51 }
 0x593   : > { %1108 = vrot.lane.b32.xlu1 %v1106_v61, %s2476_s27  ;;  %v1150_v50 = vmul.f32 %v1106_v61, %v2083_v7 }
 0x594   : > { %1110 = vrot.lane.b32.xlu0 %v1107_v62, %s2476_s27 }
 0x597   : > { %1118 = vrot.lane.b32.xlu1 %v1106_v61, %s2477_s18 }
 0x598   : > { %1120 = vrot.lane.b32.xlu0 %v1107_v62, %s2477_s18 }
 0x59b   : > { %1128 = vrot.lane.b32.xlu1 %v1106_v61, %s2478_s19 }
 0x59c   : > { %1130 = vrot.lane.b32.xlu0 %v1107_v62, %s2478_s19  ;;  %s523_s19 = sand.u32 1, %s1910_s22  }
 0x59d   : > { %s1568_s18 = scalar_lea.sflag [#allocation5], %s523_s19 }
 0x59f   : > { %1138 = vrot.lane.b32.xlu1 %v1106_v61, %s2479_s23 }
 0x5a0   : > { %1140 = vrot.lane.b32.xlu0 %v1107_v62, %s2479_s23  ;;  %s1654_s23 = sshll.u32 %s523_s19, 4 }
 0x5a3   : > { %1154 = vrot.lane.b32.xlu1 %v1106_v61, %s2480_s26 }
 0x5a4   : > { %1156 = vrot.lane.b32.xlu0 %v1107_v62, %s2480_s26  ;;  %s1687_s26 = sshll.u32 %s2038_s25, 8 }
 0x5a5   : > { %s2387_s27 = scalar_lea.hbm %s2445_s16, %s1687_s26 }
 0x5a7   : > { %1164 = vrot.lane.b32.xlu1 %v1106_v61, %s2481_s30 }
 0x5a8   : > { %1166 = vrot.lane.b32.xlu0 %v1107_v62, %s2481_s30  ;;  %s525_s30 = scalar_lea.vmem [#allocation4], %s1654_s23  ;;  %s1931_s23 = smov [#allocation4]  }
 0x5a9   : > { %s1860_s1 = sshll.u32 %s1931_s23, 4  ;;  %s1861_s1 = int_to_ptr.vmem [resolvable:$false] %s1860_s1 }
 0x5aa   : > { %s1862_s2 = scalar_lea.vmem %s1861_s1, 512 }
 0x5ab   : > { %1174 = vrot.lane.b32.xlu1 %v1106_v61, %s2482_s20 }
 0x5ac   : > { %1176 = vrot.lane.b32.xlu0 %v1107_v62, %s2482_s20  ;;  %s1582_s20 = sshll.u32 %s525_s30, 4  ;;  %s2389_s20 = int_to_ptr.vmem [resolvable:$true] %s1582_s20 }
 0x5ad   : > { %s1856_s25 = scalar_lea.vmem %s2389_s20, 256  ;;  %p1863_p0 = scmp.lt.s32.totalorder %s2389_s20, %s1861_s1 }
 0x5ae   : > { %p1857_p11 = scmp.ne.s32.totalorder %s2389_s20, %s1856_s25  ;;  %p1864_p1 = scmp.lt.s32.totalorder %s1862_s2, %s1856_s25 }
 0x5af   : > { %1184 = vrot.lane.b32.xlu1 %v1106_v61, %s2483_s28 }
 0x5b0   : > { %1186 = vrot.lane.b32.xlu0 %v1107_v62, %s2483_s28  ;;  %p1858_p12 = pnand %p1857_p11, %p2055_p5  ;;  %p1865_p2 = por %p1864_p1, %p1863_p0 }
 0x5b2   : > { %p1859_p13 = pneg %p1858_p12 }
 0x5b3   : > { %1214 = vperm.xlu1 %1831, %v544_v48  }
 0x5b4   : > { %p1866_p3 = pnand %p1865_p2, %p1859_p13 }
 0x605   : > { %v1109_v49 = vpop.permute.xlu1 %1108 }
 0x606   : > { %v1111_v63 = vpop.permute.xlu0 %1110 }
 0x607   : > { %v1112_v0 = vsel %vm603_vm1, %v1109_v49, %v1111_v63  ;;  %v1113_v1 = vsel %vm603_vm1, %v1111_v63, %v1109_v49 }
 0x608   : > { %v1114_v3 = vmul.f32 %v1113_v1, %v2137_v25  ;;  %v1115_v12 = vmul.f32 %v1112_v0, %v2140_v26 }
 0x609   : > { %v1119_v2 = vpop.permute.xlu1 %1118 }
 0x60a   : > { %v1121_v6 = vpop.permute.xlu0 %1120 }
 0x60b   : > { %v1122_v10 = vsel %vm625_vm0, %v1119_v2, %v1121_v6  ;;  %v1123_v11 = vsel %vm625_vm0, %v1121_v6, %v1119_v2 }
 0x60c   : > { %v1124_v13 = vmul.f32 %v1123_v11, %v2131_v23  ;;  %v1125_v15 = vmul.f32 %v1122_v10, %v2134_v24 }
 0x60d   : > { %v1129_v16 = vpop.permute.xlu1 %1128 }
 0x60e   : > { %v1726_v18 = vpack.c.bf16 %v1124_v13, %v1114_v3  ;;  %v1131_v19 = vpop.permute.xlu0 %1130  ;;  %v1724_v20 = vpack.c.bf16 %v1125_v15, %v1115_v12 }
 0x60f   : > { %v1132_v21 = vsel %vm653_vm3, %v1129_v16, %v1131_v19  ;;  %v1133_v31 = vsel %vm653_vm3, %v1131_v19, %v1129_v16 }
 0x610   : > { %1725 = vmatprep.subr.bf16.mxu1 %v1724_v20  ;;  %v1134_v24 = vmul.f32 %v1133_v31, %v2150_v29  ;;  %v1135_v33 = vmul.f32 %v1132_v21, %v2159_v34  ;;  %v546_v20 = vld [vmem:[%s2442_s13] sm:$0xff] }
 0x611   : > { %1727 = vmatpush1.bf16.msra.mxu1 %v1726_v18  ;;  %v1139_v32 = vpop.permute.xlu1 %1138 }
 0x612   : > { %v1141_v25 = vpop.permute.xlu0 %1140 }
 0x613   : > { %v1142_v26 = vsel %vm675_vm2, %v1139_v32, %v1141_v25  ;;  %v1143_v23 = vsel %vm675_vm2, %v1141_v25, %v1139_v32  ;;  %v547_v32 = vld [vmem:[%s2443_s14] sm:$0xff] }
 0x614   : > { %v1144_v37 = vmul.f32 %v1143_v23, %v2143_v27  ;;  %v1145_v38 = vmul.f32 %v1142_v26, %v2146_v28  ;;  %v1151_v27 = vmul.f32 %v1107_v62, %v2086_v8 }
 0x615   : > { %v1155_v39 = vpop.permute.xlu1 %1154 }
 0x616   : > { %v1730_v4 = vpack.c.bf16 %v1144_v37, %v1134_v24  ;;  %v1157_v40 = vpop.permute.xlu0 %1156  ;;  %v1728_v45 = vpack.c.bf16 %v1145_v38, %v1135_v33 }
 0x617   : > { %v1158_v46 = vsel %vm720_vm4, %v1155_v39, %v1157_v40  ;;  %v1159_v47 = vsel %vm720_vm4, %v1157_v40, %v1155_v39 }
 0x618   : > { %v1160_v29 = vmul.f32 %v1158_v46, %v2163_v35  ;;  %v1161_v34 = vmul.f32 %v1159_v47, %v2166_v36  ;;  %1729 = vmatprep.subr.bf16.mxu1 %v1728_v45 }
 0x619   : > { %1731 = vmatpush1.bf16.msra.mxu1 %v1730_v4  ;;  %v1165_v28 = vpop.permute.xlu1 %1164 }
 0x61a   : > { %v1734_v51 = vpack.c.bf16 %v1160_v29, %v1150_v50  ;;  %v1167_v52 = vpop.permute.xlu0 %1166  ;;  %v1732_v53 = vpack.c.bf16 %v1161_v34, %v1151_v27 }
 0x61b   : > { %v1168_v54 = vsel %vm748_vm6, %v1165_v28, %v1167_v52  ;;  %v1169_v55 = vsel %vm748_vm6, %v1167_v52, %v1165_v28 }
 0x61c   : > { %1733 = vmatprep.subr.bf16.mxu1 %v1732_v53  ;;  %v1170_v56 = vmul.f32 %v1168_v54, %v2176_v43  ;;  %v1171_v57 = vmul.f32 %v1169_v55, %v2192_v60 }
 0x61d   : > { %1735 = vmatpush1.bf16.msra.mxu1 %v1734_v51  ;;  %v1175_v7 = vpop.permute.xlu1 %1174 }
 0x61e   : > { %v1177_v35 = vpop.permute.xlu0 %1176 }
 0x61f   : > { %v1178_v36 = vsel %vm770_vm5, %v1175_v7, %v1177_v35  ;;  %v1179_v8 = vsel %vm770_vm5, %v1177_v35, %v1175_v7 }
 0x620   : > { %v1180_v58 = vmul.f32 %v1178_v36, %v2170_v41  ;;  %v1181_v59 = vmul.f32 %v1179_v8, %v2173_v42  ;;  %v543_v41 = vld [vmem:[%s2439_s10] sm:$0xff] }
 0x621   : > { %v1185_v61 = vpop.permute.xlu1 %1184 }
 0x622   : > { %v1738_v62 = vpack.c.bf16 %v1180_v58, %v1170_v56  ;;  %v1187_v48 = vpop.permute.xlu0 %1186  ;;  %v1736_v49 = vpack.c.bf16 %v1181_v59, %v1171_v57 }
 0x623   : > { %v1189_v63 = vsel %vm798_vm7, %v1187_v48, %v1185_v61  ;;  %v1188_v0 = vsel %vm798_vm7, %v1185_v61, %v1187_v48 }
 0x624   : > { %v1191_v1 = vmul.f32 %v1189_v63, %v2214_v30  ;;  %1737 = vmatprep.subr.bf16.mxu1 %v1736_v49  ;;  %v1190_v43 = vmul.f32 %v1188_v0, %v2211_v22 }
 0x625   : > { %1739 = vmatpush1.bf16.msra.mxu1 %v1738_v62 }
 0x626   : > { %1237 = vmatprep.subr.mxu1 %v1191_v1 }
 0x629   : > { %1238 = vmatpush1.msra.mxu1 %v1190_v43 }
 0x62a   : > { %1673 = vmatmul.mubr.msk.f32.vlgmr.msra.gmra.mrb[4].mxu1 %vm1217_vm13, %v543_v41 }
 0x632   : > { %v1215_v42 = vpop.permute.xlu1 %1214 }
 0x6fd   : > { %v1287_v60 = vpop.f32.mrb[4].mxu1 }
 0x6fe   : > { %v1288_v2 = vadd.f32 %v1287_v60, %v1215_v42  ;;  %v1289_v6 = vpop.f32.mrb[5].mxu1 }
 0x6ff   : > { %v1290_v17 = vadd.f32 %v1289_v6, %v1215_v42 }
 0x701   : > { %v1292_v10 = vadd.f32 %v1290_v17, %v1288_v2 }
 0x703   : > { %1293 = vadd.xlane.f32.xlu0 %v1292_v10 }
 0x790   : > { %v1294_v30 = vpop.xlane.xlu0 %1293 }
 0x791   : > { %v1295_v11 = vmul.f32 0.00390625, %v1294_v30 }
 0x793   : > { %1707 = vmatpush3.msra.mxu0 %v1295_v11 }
 0x794   : > { %1709 = vmatmul.mubr.msk.f32.vlgmr.msra.gmra.mrb[2].mxu0 %vm921_vm11, %v2253_v44  ;;  %1711 = vmatprep.subr.mxu0 %v1928_v14 }
 0x795   : > { %1713 = vmatprep.mubr.msk.f32.mxu0 %vm1930_vm10, %v1928_v14 }
 0x867   : > { %v1362_v22 = vpop.f32.mrb[2].mxu0 }
 0x868   : > { %1368 = vperm.xlu1 %1831, %v1362_v22   ;;  %v1710_v3 = vpop.f32.mrb[3].mxu0 }
 0x8e7   : > { %v1369_v12 = vpop.permute.xlu1 %1368 }
 0x8e8   : > { %v1371_v13 = vsub.f32 %v1288_v2, %v1369_v12  ;;  %v1372_v15 = vsub.f32 %v1290_v17, %v1369_v12 }
 0x8ea   : > { %v1373_v16 = vmul.f32 %v1371_v13, %v1371_v13  ;;  %v1374_v18 = vmul.f32 %v1372_v15, %v1372_v15 }
 0x8ec   : > { %v1375_v19 = vadd.f32 %v1374_v18, %v1373_v16 }
 0x8ee   : > { %1376 = vadd.xlane.f32.xlu1 %v1375_v19 }
 0x8ff   : > { %1460 = vperm.xlu1 %1831, %v546_v20  }
 0x97b   : > { %v1377_v21 = vpop.xlane.xlu1 %1376 }
 0x97c   : > { %v1378_v31 = vmul.f32 0.00390625, %v1377_v21 }
 0x97e   : > { %1712 = vmatpush3.msra.mxu0 %v1378_v31 }
 0x97f   : > { %1714 = vmatmul.mubr.msk.f32.vlgmr.msra.gmra.mrb[4].mxu0 %vm921_vm11, %v2253_v44  ;;  %1678 = vmatprep.subr.msk.mxu0 %vm835_vm8, %v2090_v9  ;;  %v545_v44 = vld [vmem:[%s2441_s12] sm:$0xff]  ;;  %v1461_v4 = vpop.permute.xlu1 %1460 }
 0x980   : > { %1679 = vmatpush1.msk.msra.mxu0 %vm835_vm8, %v2077_v5  ;;  %1556 = vmatprep.mubr.f32.mxu0 %v1928_v14  ;;  %v548_v5 = vld [vmem:[%s2444_s15] sm:$0xff] }
 0x983   : > { %1680 = vmatmul.mubr.msk.f32.vlgmr.msra.gmra.mrb[6].mxu0 %vm1484_vm14, %v547_v32 }
 0xa52   : > { %v1445_v25 = vpop.f32.mrb[4].mxu0 }
 0xa53   : > { %v1446_v26 = vadd.f32 1e-05, %v1445_v25  ;;  %v1715_v23 = vpop.f32.mrb[5].mxu0 }
 0xa55   : > { %1846 = vrsqrt.f32 %v1446_v26 }
 0xa56   : > { %v1558_v14 = vpop.f32.mrb[6].mxu0 }
 0xa57   : > { %v1560_v33 = vpop.f32.mrb[7].mxu0 }
 0xa5f   : > { %v1847_v9 = vpop.eup %1846 }
 0xa60   : > { %v1450_v24 = vmul.f32 %v1847_v9, %v545_v44 }
 0xa62   : > { %1453 = vperm.xlu0 %1830, %v1450_v24  }
 0xa66   : > { %1481 = vperm.xlu0 %1830, %v548_v5  }
 0xae1   : > { %v1454_v37 = vpop.permute.xlu0 %1453 }
 0xae2   : > { %v1456_v38 = vmul.f32 %v1454_v37, %v1371_v13  ;;  %v1457_v39 = vmul.f32 %v1454_v37, %v1372_v15 }
 0xae4   : > { %v1463_v40 = vadd.f32 %v1461_v4, %v1456_v38  ;;  %v1464_v45 = vadd.f32 %v1461_v4, %v1457_v39 }
 0xae5   : > { %v1482_v28 = vpop.permute.xlu0 %1481 }
 0xae6   : > { %v1676_v46 = vmul.f32 -1.442695, %v1463_v40  ;;  %v1677_v47 = vmul.f32 -1.442695, %v1464_v45  ;;  %v1559_v54 = vadd.f32 %v1558_v14, %v1482_v28  ;;  %v1561_v7 = vadd.f32 %v1560_v33, %v1482_v28 }
 0xae8   : > { %1848 = vpow2.f32 %v1676_v46 }
 0xae9   : > { %1850 = vpow2.f32 %v1677_v47 }
 0xaf2   : > { %v1849_v50 = vpop.eup %1848 }
 0xaf3   : > { %v1851_v29 = vpop.eup %1850  ;;  %v1471_v34 = vadd.f32 1.0, %v1849_v50 }
 0xaf4   : > { %v1472_v27 = vadd.f32 1.0, %v1851_v29 }
 0xaf5   : > { %1852 = vrcp.f32 %v1471_v34 }
 0xaf6   : > { %1854 = vrcp.f32 %v1472_v27 }
 0xaff   : > { %v1853_v51 = vpop.eup %1852 }
 0xb00   : > { %v1855_v52 = vpop.eup %1854  ;;  %v1477_v53 = vmul.f32 %v1853_v51, %v1463_v40 }
 0xb01   : > { %v1478_v55 = vmul.f32 %v1855_v52, %v1464_v45 }
 0xb02   : > { %v1563_v35 = vadd.f32 %v1559_v54, %v1477_v53 }
 0xb03   : > { %v1564_v36 = vadd.f32 %v1561_v7, %v1478_v55 }
 0xb04   : > { %1565 = vst [vmem:[%s525_s30] sm:$0xff] %v1563_v35 }
 0xb05   : > { %1566 = vst [vmem:[%s525_s30 + $0x8] sm:$0xff] %v1564_v36 }
 0xb06   : > { %1869 = shalt.err (!%p1866_p3)
}
 0xb07   : > { %s1870_s19 = scalar_lea.hbm %s2387_s27, 256  ;;  %s1874_s28 = scalar_lea.hbm %s2445_s16, 512 }
 0xb08   : > { %p1871_p4 = scmp.ne.s32.totalorder %s2387_s27, %s1870_s19  ;;  %p1875_p9 = scmp.lt.u32.totalorder %s2387_s27, %s2445_s16 }
 0xb09   : > { %p1876_p10 = scmp.lt.u32.totalorder %s1874_s28, %s1870_s19  ;;  %p1878_p12 = scmp.lt.u32.totalorder %s1870_s19, %s2387_s27 }
 0xb0a   : > { %p1872_p7 = pnand %p1871_p4, %p2055_p5 }
 0xb0b   : > { %p1877_p11 = por %p1876_p10, %p1875_p9 }
 0xb0c   : > { %p1873_p8 = pneg %p1872_p7 }
 0xb0d   : > { %p1879_p13 = por %p1878_p12, %p1877_p11 }
 0xb0f   : > { %p1880_p0 = pnand %p1879_p13, %p1873_p8 }
 0xb11   : > { %1883 = shalt.err (!%p1880_p0)
}
 0xb12   : > { %1740 = dma.vmem_to_hbm [thread:$0]  (%p2055_p5), %s2389_s20, 256, %s2387_s27, %s1568_s18  }
 0xb13 PF: > { %p1746_p1 = scmp.ge.s32.totalorder %s1918_s24, 2  ;;  %s1594_s2 = sand.u32 1, %s1906_s21  }
 0xb14   : > { %s1595_s25 = scalar_lea.sflag [#allocation5], %s1594_s2 }
 0xb15   : > { %p1743_p2 = pnand %p1746_p1, %p2059_p6 }
 0xb17   : > { %1901 = dma.done.wait (!%p1743_p2), %s1595_s25, 256  }
 0xb18   : > { %1903 = vsyncadd (!%p1743_p2), %s1595_s25, 4294967040  ;;  %s2484_s24 = sld [smem:[#allocation8_spill]]  ;;  %s2485_s23 = sld [smem:[#allocation7_spill]] }
 0xb19   : > { %s2486_s19 = sld [smem:[#allocation9_spill]]  ;;  %s2487_s21 = smov %s1910_s22 }
 0xb1e   : > { %p26_p3 = scmp.ge.s32.totalorder %s2484_s24, 4   ;;  %s2488_s22 = smov %s2485_s23 }
 0xb1f   : > { %s2489_s23 = smov %s2486_s19 }
 0xb20   :  { %28 = sbr.rel (!%p26_p3) target bundleno = 7 (0x7), region = 130 }
 0xb27   :  { %1600 = vsyncpa [#allocation5], 1 }
 0xb28   :  { %1602 = vsyncpa [#allocation5 + $0x1], 1 }

</bundles_post_ra>
